<compile_context>
chip_gen: v7x
topology: tpu7x:2x2x1
jax: 0.10.0
libtpu: 0.0.40
codegen_flags: <defaults>
</compile_context>

<pallas_src>
import jax
import jax.numpy as jnp
from jax.experimental import pallas as pl
from jax.experimental.pallas import tpu as pltpu

BN_EPS = 1e-5
_FUSED_VMEM_BUDGET = 12 * 1024 * 1024     # whole-M fused path footprint limit
_TILE_M = 256                             # row tile of the M-tiled path


def _round_up(x, m):
    return -(-x // m) * m


def _vmem_limit(est_bytes):
    """Scoped-VMEM request sized from the block footprint, with headroom but
    safely under the smallest physical VMEM (64 MiB on v7x)."""
    return int(min(48 * 1024 * 1024, max(16 * 1024 * 1024, 2 * est_bytes)))


def _pick_tk(K):
    """Lane-aligned (multiple-of-128) K tile, preferring >= 2 pipeline steps."""
    Kp = _round_up(K, 128)
    if Kp <= 128:
        return 128
    for cand in (512, 384, 256, 128):
        if Kp % cand == 0 and Kp // cand >= 2:
            return cand
    return 128


# ------------------------------ Pallas kernels ------------------------------

def _fused_matmul_bn_kernel(m_real, has_residual, apply_relu, eps):
    """Whole-M fused kernel: K-tiled MXU matmul into an f32 accumulator and,
    on the last K step, training-mode BN (+residual, +ReLU) with a stable
    masked (x-mean)^2 variance.  Output stored in bf16."""
    inv_m = 1.0 / float(m_real)

    def kernel(*refs):
        if has_residual:
            a_ref, b_ref, g_ref, bt_ref, r_ref, o_ref, acc_ref = refs
        else:
            a_ref, b_ref, g_ref, bt_ref, o_ref, acc_ref = refs
        k = pl.program_id(0)

        @pl.when(k == 0)
        def _():
            acc_ref[...] = jnp.zeros_like(acc_ref)

        acc_ref[...] += jnp.dot(a_ref[...], b_ref[...],
                                preferred_element_type=jnp.float32)

        @pl.when(k == pl.num_programs(0) - 1)
        def _():
            x = acc_ref[...]
            row = jax.lax.broadcasted_iota(jnp.int32, x.shape, 0)
            mask = (row < m_real).astype(jnp.float32)
            # Padded rows are exactly zero, so the raw sum only needs 1/M_real.
            mean = jnp.sum(x, axis=0, keepdims=True) * inv_m
            d = (x - mean) * mask
            var = jnp.sum(d * d, axis=0, keepdims=True) * inv_m
            y = d * (jax.lax.rsqrt(var + eps) * g_ref[...]) + bt_ref[...]
            if has_residual:
                y = y + r_ref[...].astype(jnp.float32)
            if apply_relu:
                y = jnp.maximum(y, 0.0)
            o_ref[...] = y.astype(o_ref.dtype)

    return kernel


def _matmul_kernel(a_ref, b_ref, o_ref, acc_ref):
    """Plain K-tiled matmul (M axis 'parallel'), bf16 out, f32 accumulator."""
    k = pl.program_id(1)

    @pl.when(k == 0)
    def _():
        acc_ref[...] = jnp.zeros_like(acc_ref)

    acc_ref[...] += jnp.dot(a_ref[...], b_ref[...],
                            preferred_element_type=jnp.float32)

    @pl.when(k == pl.num_programs(1) - 1)
    def _():
        o_ref[...] = acc_ref[...].astype(o_ref.dtype)


def _bn_stats_kernel(m_real, eps, tile_m):
    """Two-pass (mean, then masked (x-mean)^2) training BatchNorm statistics
    accumulated over M tiles, folded with gamma/beta into scale/bias."""
    inv_m = 1.0 / float(m_real)

    def kernel(y_ref, g_ref, bt_ref, o_ref, acc_ref):
        phase = pl.program_id(0)
        i = pl.program_id(1)
        last = pl.num_programs(1) - 1
        x = y_ref[...].astype(jnp.float32)

        @pl.when((phase == 0) & (i == 0))
        def _():
            acc_ref[...] = jnp.zeros_like(acc_ref)

        @pl.when(phase == 0)
        def _():
            # Padded rows are exactly zero -> no masking needed for the sum.
            acc_ref[0:1, :] = acc_ref[0:1, :] + jnp.sum(x, axis=0, keepdims=True)

        @pl.when((phase == 0) & (i == last))
        def _():
            acc_ref[0:1, :] = acc_ref[0:1, :] * inv_m          # -> mean

        @pl.when(phase == 1)
        def _():
            row = jax.lax.broadcasted_iota(jnp.int32, x.shape, 0) + i * tile_m
            mask = (row < m_real).astype(jnp.float32)
            d = (x - acc_ref[0:1, :]) * mask
            acc_ref[1:2, :] = acc_ref[1:2, :] + jnp.sum(d * d, axis=0,
                                                        keepdims=True)

        @pl.when((phase == 1) & (i == last))
        def _():
            mean = acc_ref[0:1, :]
            var = acc_ref[1:2, :] * inv_m
            scale = g_ref[...] * jax.lax.rsqrt(var + eps)
            o_ref[0:1, :] = scale
            o_ref[1:2, :] = bt_ref[...] - mean * scale

    return kernel


def _bn_apply_kernel(has_residual, apply_relu):
    """y * scale + bias (+residual) (+ReLU), tiled over M, bf16 in/out."""
    def kernel(*refs):
        if has_residual:
            y_ref, sb_ref, r_ref, o_ref = refs
        else:
            y_ref, sb_ref, o_ref = refs
        out = y_ref[...].astype(jnp.float32) * sb_ref[0:1, :] + sb_ref[1:2, :]
        if has_residual:
            out = out + r_ref[...].astype(jnp.float32)
        if apply_relu:
            out = jnp.maximum(out, 0.0)
        o_ref[...] = out.astype(o_ref.dtype)

    return kernel


def _maxpool9_kernel(*refs):
    """Elementwise max over 9 shifted views (3x3/s2/p1 pool)."""
    o_ref = refs[-1]
    m = refs[0][...]
    for r in refs[1:-1]:
        m = jnp.maximum(m, r[...])
    o_ref[...] = m


def _avgpool_fc_kernel(x_ref, w_ref, b_ref, o_ref):
    """Global average pool over the spatial axis + linear layer."""
    feat = jnp.mean(x_ref[...].astype(jnp.float32), axis=1)
    o_ref[...] = jnp.dot(feat.astype(jnp.bfloat16), w_ref[...],
                         preferred_element_type=jnp.float32) + b_ref[...]


# --------------------------- matmul + BN wrappers ----------------------------

def matmul_bn(a, b, gamma, beta, residual=None, relu=True, eps=BN_EPS,
              force_tiled=False):
    """(M,K)bf16 @ (K,N)bf16 -> training-mode BN (+residual)(+ReLU) -> (M,N)bf16.

    Small problems use one fused kernel (whole M resident in VMEM); large
    problems use an M-tiled path (matmul -> two-pass stats -> apply)."""
    M, K = a.shape
    Kb, N = b.shape
    assert K == Kb
    tk = _pick_tk(K)
    K_pad = _round_up(K, tk)
    if K_pad != K:                     # zero K padding: no effect on the matmul
        a = jnp.pad(a, ((0, 0), (0, K_pad - K)))
        b = jnp.pad(b, ((0, K_pad - K), (0, 0)))
    g2 = gamma.reshape(1, N).astype(jnp.float32)
    bt2 = beta.reshape(1, N).astype(jnp.float32)

    M8 = _round_up(M, 8)
    # double-buffered A/B blocks (bf16) + f32 acc + bf16 out (+ bf16 residual)
    fused_bytes = (4 * tk * (M8 + N) + 4 * M8 * N + 4 * M8 * N
                   + (4 * M8 * N if residual is not None else 0))
    if not force_tiled and fused_bytes <= _FUSED_VMEM_BUDGET:
        return _matmul_bn_fused(a, b, g2, bt2, residual, relu, eps,
                                M, M8, tk, K_pad, N, fused_bytes)
    return _matmul_bn_tiled(a, b, g2, bt2, residual, relu, eps,
                            M, tk, K_pad, N)


def _matmul_bn_fused(a, b, g2, bt2, residual, relu, eps, M, M_pad, tk, K_pad, N,
                     est_bytes):
    if M_pad != M:
        a = jnp.pad(a, ((0, M_pad - M), (0, 0)))
    kernel = _fused_matmul_bn_kernel(M, residual is not None, relu, eps)
    in_specs = [pl.BlockSpec((M_pad, tk), lambda k: (0, k)),     # A
                pl.BlockSpec((tk, N), lambda k: (k, 0)),         # B
                pl.BlockSpec((1, N), lambda k: (0, 0)),          # gamma
                pl.BlockSpec((1, N), lambda k: (0, 0))]          # beta
    args = [a, b, g2, bt2]
    if residual is not None:
        res = residual.astype(jnp.bfloat16)
        if M_pad != M:
            res = jnp.pad(res, ((0, M_pad - M), (0, 0)))
        in_specs.append(pl.BlockSpec((M_pad, N), lambda k: (0, 0)))
        args.append(res)
    out = pl.pallas_call(
        kernel,
        out_shape=jax.ShapeDtypeStruct((M_pad, N), jnp.bfloat16),
        grid=(K_pad // tk,),
        in_specs=in_specs,
        out_specs=pl.BlockSpec((M_pad, N), lambda k: (0, 0)),
        scratch_shapes=[pltpu.VMEM((M_pad, N), jnp.float32)],
        compiler_params=pltpu.CompilerParams(
            dimension_semantics=("arbitrary",),
            vmem_limit_bytes=_vmem_limit(est_bytes)),
    )(*args)
    return out[:M]


def _matmul_bn_tiled(a, b, g2, bt2, residual, relu, eps, M, tk, K_pad, N):
    tm = _TILE_M
    M_pad = _round_up(M, tm)
    if M_pad != M:
        a = jnp.pad(a, ((0, M_pad - M), (0, 0)))

    # 1) M-tiled matmul ('parallel' M axis -> both TensorCores on v7x).
    mm_bytes = 4 * tm * tk + 4 * tk * N + 4 * tm * N + 4 * tm * N
    y = pl.pallas_call(
        _matmul_kernel,
        out_shape=jax.ShapeDtypeStruct((M_pad, N), jnp.bfloat16),
        grid=(M_pad // tm, K_pad // tk),
        in_specs=[pl.BlockSpec((tm, tk), lambda i, k: (i, k)),
                  pl.BlockSpec((tk, N), lambda i, k: (k, 0))],
        out_specs=pl.BlockSpec((tm, N), lambda i, k: (i, 0)),
        scratch_shapes=[pltpu.VMEM((tm, N), jnp.float32)],
        compiler_params=pltpu.CompilerParams(
            dimension_semantics=("parallel", "arbitrary"),
            vmem_limit_bytes=_vmem_limit(mm_bytes)),
    )(a, b)

    # 2) Two-pass BN statistics folded into per-channel scale / bias.
    sb = pl.pallas_call(
        _bn_stats_kernel(M, eps, tm),
        out_shape=jax.ShapeDtypeStruct((2, N), jnp.float32),
        grid=(2, M_pad // tm),
        in_specs=[pl.BlockSpec((tm, N), lambda p, i: (i, 0)),
                  pl.BlockSpec((1, N), lambda p, i: (0, 0)),
                  pl.BlockSpec((1, N), lambda p, i: (0, 0))],
        out_specs=pl.BlockSpec((2, N), lambda p, i: (0, 0)),
        scratch_shapes=[pltpu.VMEM((2, N), jnp.float32)],
        compiler_params=pltpu.CompilerParams(
            dimension_semantics=("arbitrary", "arbitrary"),
            vmem_limit_bytes=_vmem_limit(8 * tm * N)),
    )(y, g2, bt2)

    # 3) Normalize + residual + ReLU, tiled over M ('parallel').
    kernel = _bn_apply_kernel(residual is not None, relu)
    in_specs = [pl.BlockSpec((tm, N), lambda i: (i, 0)),
                pl.BlockSpec((2, N), lambda i: (0, 0))]
    args = [y, sb]
    if residual is not None:
        res = residual.astype(jnp.bfloat16)
        if M_pad != M:
            res = jnp.pad(res, ((0, M_pad - M), (0, 0)))
        in_specs.append(pl.BlockSpec((tm, N), lambda i: (i, 0)))
        args.append(res)
    out = pl.pallas_call(
        kernel,
        out_shape=jax.ShapeDtypeStruct((M_pad, N), jnp.bfloat16),
        grid=(M_pad // tm,),
        in_specs=in_specs,
        out_specs=pl.BlockSpec((tm, N), lambda i: (i, 0)),
        compiler_params=pltpu.CompilerParams(
            dimension_semantics=("parallel",),
            vmem_limit_bytes=_vmem_limit(12 * tm * N)),
    )(*args)
    return out[:M]


# ------------------------------ layer wrappers -------------------------------

def conv2d_bn(x, w_mat, ksz, stride, padding, gamma, beta,
              residual=None, relu=True):
    """x: NHWC bf16; w_mat: (ksz*ksz*Cin, Cout) bf16 (HWIO-flattened, no bias).
    Fused conv + training-mode BN + optional residual add + optional ReLU."""
    N, H, W, Cin = x.shape
    K, Cout = w_mat.shape
    assert K == ksz * ksz * Cin
    Hout = (H + 2 * padding - ksz) // stride + 1
    Wout = (W + 2 * padding - ksz) // stride + 1
    xp = jnp.pad(x, ((0, 0), (padding, padding), (padding, padding), (0, 0))) \
        if padding else x
    # TODO(synk): move this im2col in-kernel (implicit GEMM over shifted pl.ds
    # windows of the padded NHWC slab) to kill the ksz*ksz read amplification.
    views = [xp[:, dy:dy + stride * Hout:stride, dx:dx + stride * Wout:stride, :]
             for dy in range(ksz) for dx in range(ksz)]
    if ksz == 1:
        a = views[0].reshape(N * Hout * Wout, Cin)
    else:
        a = jnp.concatenate(views, axis=-1).reshape(N * Hout * Wout, K)
    res2d = residual.reshape(N * Hout * Wout, Cout) if residual is not None else None
    out = matmul_bn(a, w_mat, gamma, beta, residual=res2d, relu=relu)
    return out.reshape(N, Hout, Wout, Cout)


def maxpool_3x3_s2_p1(x):
    """3x3 / stride-2 / pad-1 max pool on bf16 NHWC, tiled over rows."""
    N, H, W, C = x.shape
    Hout = (H + 2 - 3) // 2 + 1
    Wout = (W + 2 - 3) // 2 + 1
    neg = float(jnp.finfo(x.dtype).min)
    xp = jnp.pad(x, ((0, 0), (1, 1), (1, 1), (0, 0)), constant_values=neg)
    M = N * Hout * Wout
    views = [xp[:, dy:dy + 2 * Hout:2, dx:dx + 2 * Wout:2, :].reshape(M, C)
             for dy in range(3) for dx in range(3)]
    tm = min(1024, _round_up(M, 8))
    M_pad = _round_up(M, tm)
    if M_pad != M:
        views = [jnp.pad(v, ((0, M_pad - M), (0, 0))) for v in views]
    out = pl.pallas_call(
        _maxpool9_kernel,
        out_shape=jax.ShapeDtypeStruct((M_pad, C), x.dtype),
        grid=(M_pad // tm,),
        in_specs=[pl.BlockSpec((tm, C), lambda i: (i, 0))] * 9,
        out_specs=pl.BlockSpec((tm, C), lambda i: (i, 0)),
        compiler_params=pltpu.CompilerParams(
            dimension_semantics=("parallel",),
            vmem_limit_bytes=_vmem_limit(40 * tm * C)),
    )(*views)
    return out[:M].reshape(N, Hout, Wout, C)


def avgpool_fc(x, fc_w, fc_b):
    """Fused AdaptiveAvgPool2d((1,1)) + flatten + Linear, lane-dense output."""
    N, H, W, C = x.shape
    num_classes = fc_w.shape[0]
    Np = _round_up(num_classes, 128)
    wT = jnp.pad(fc_w.T.astype(jnp.bfloat16), ((0, 0), (0, Np - num_classes)))
    bp = jnp.pad(fc_b.reshape(1, -1).astype(jnp.float32),
                 ((0, 0), (0, Np - num_classes)))
    x3 = x.reshape(N, H * W, C)
    out = pl.pallas_call(
        _avgpool_fc_kernel,
        out_shape=jax.ShapeDtypeStruct((N, Np), jnp.float32),
    )(x3, wT, bp)
    return out[:, :num_classes]


# ----------------------------- model definition ------------------------------

def init_params(key, layers=(2, 2, 2, 2), num_classes=10):
    """ResNet1(BasicBlock, layers) parameters, deterministic init."""
    k = key

    def nk():
        nonlocal k
        k, sub = jax.random.split(k)
        return sub

    def conv_w(cout, cin, ksz):
        # kaiming_normal_(mode='fan_out', nonlinearity='relu') on OIHW, stored
        # pre-reshaped to matmul form (kh*kw*Cin, Cout) and pre-cast to bf16.
        std = (2.0 / (cout * ksz * ksz)) ** 0.5
        w = jax.random.normal(nk(), (cout, cin, ksz, ksz), jnp.float32) * std
        return jnp.transpose(w, (2, 3, 1, 0)).reshape(ksz * ksz * cin, cout) \
                  .astype(jnp.bfloat16)

    params = {
        'conv1_w': conv_w(64, 3, 7),
        'bn1_g': jnp.ones((64,), jnp.float32),
        'bn1_b': jnp.zeros((64,), jnp.float32),
    }
    inplanes = 64
    stages = []
    for stage_idx, (planes, nblocks) in enumerate(zip((64, 128, 256, 512), layers)):
        stride = 1 if stage_idx == 0 else 2
        blocks = []
        for bidx in range(nblocks):
            s = stride if bidx == 0 else 1
            blk = {
                'conv1_w': conv_w(planes, inplanes, 3),
                'bn1_g': jnp.ones((planes,), jnp.float32),
                'bn1_b': jnp.zeros((planes,), jnp.float32),
                'conv2_w': conv_w(planes, planes, 3),
                'bn2_g': jnp.ones((planes,), jnp.float32),
                'bn2_b': jnp.zeros((planes,), jnp.float32),
            }
            if s != 1 or inplanes != planes:            # BasicBlock.expansion == 1
                blk['down_w'] = conv_w(planes, inplanes, 1)
                blk['down_g'] = jnp.ones((planes,), jnp.float32)
                blk['down_b'] = jnp.zeros((planes,), jnp.float32)
            inplanes = planes
            blocks.append(blk)
        stages.append(blocks)
    params['stages'] = stages
    bound = 1.0 / (512 ** 0.5)
    params['fc_w'] = jax.random.uniform(nk(), (num_classes, 512), jnp.float32,
                                        -bound, bound)
    params['fc_b'] = jax.random.uniform(nk(), (num_classes,), jnp.float32,
                                        -bound, bound)
    return params


def basic_block_forward(x, blk, stride):
    identity = x
    if 'down_w' in blk:
        identity = conv2d_bn(x, blk['down_w'], 1, stride, 0,
                             blk['down_g'], blk['down_b'], relu=False)
    out = conv2d_bn(x, blk['conv1_w'], 3, stride, 1,
                    blk['bn1_g'], blk['bn1_b'], relu=True)
    out = conv2d_bn(out, blk['conv2_w'], 3, 1, 1,
                    blk['bn2_g'], blk['bn2_b'],
                    residual=identity, relu=True)
    return out


def resnet_forward(params, x_nchw):
    # NCHW (PyTorch layout) -> NHWC; activations carried in bf16 end-to-end.
    x = jnp.transpose(x_nchw, (0, 2, 3, 1)).astype(jnp.bfloat16)
    x = conv2d_bn(x, params['conv1_w'], 7, 2, 3,
                  params['bn1_g'], params['bn1_b'], relu=True)
    x = maxpool_3x3_s2_p1(x)
    for stage_idx, blocks in enumerate(params['stages']):
        for bidx, blk in enumerate(blocks):
            stride = 2 if (stage_idx > 0 and bidx == 0) else 1
            x = basic_block_forward(x, blk, stride)
    return avgpool_fc(x, params['fc_w'], params['fc_b'])


if __name__ == "__main__":
    key = jax.random.PRNGKey(0)
    pkey, xkey, ckey = jax.random.split(key, 3)

    # -- numerical self-check: both matmul+BN paths vs a pure-jnp reference ----
    ka, kb, kr = jax.random.split(ckey, 3)
    Mc, Kc, Nc = 300, 200, 128
    a = jax.random.normal(ka, (Mc, Kc), jnp.float32).astype(jnp.bfloat16)
    bmat = (0.05 * jax.random.normal(kb, (Kc, Nc), jnp.float32)).astype(jnp.bfloat16)
    r = jax.random.normal(kr, (Mc, Nc), jnp.float32).astype(jnp.bfloat16)
    g = jnp.linspace(0.5, 1.5, Nc, dtype=jnp.float32)
    bt = jnp.linspace(-0.2, 0.2, Nc, dtype=jnp.float32)
    xf = a.astype(jnp.float32) @ bmat.astype(jnp.float32)
    mu = xf.mean(0, keepdims=True)
    var = ((xf - mu) ** 2).mean(0, keepdims=True)
    want = jnp.maximum((xf - mu) * jax.lax.rsqrt(var + BN_EPS) * g + bt
                       + r.astype(jnp.float32), 0.0)
    for force_tiled in (False, True):
        got = matmul_bn(a, bmat, g, bt, residual=r, relu=True,
                        force_tiled=force_tiled).astype(jnp.float32)
        assert jnp.allclose(got, want, atol=0.1, rtol=0.05), \
            f"matmul_bn mismatch (force_tiled={force_tiled})"

    # -- full ResNet1(BasicBlock, [2, 2, 2, 2]) forward (stem needs 3 channels) -
    params = init_params(pkey, layers=(2, 2, 2, 2), num_classes=10)
    x = jax.random.normal(xkey, (2, 3, 32, 32), jnp.float32)   # NCHW, like PyTorch
    logits = jax.jit(resnet_forward)(params, x)
    jax.block_until_ready(logits)
    assert logits.shape == (2, 10) and logits.dtype == jnp.float32
    print("KERNEL_OK")
</pallas_src>

<mosaic_0001>
module attributes {stable_mosaic.version = 11 : i64} {
  func.func @kernel(%arg0: i32, %arg1: memref<304x128xbf16, #tpu.memory_space<vmem>>, %arg2: memref<128x128xbf16, #tpu.memory_space<vmem>>, %arg3: memref<1x128xf32, #tpu.memory_space<vmem>>, %arg4: memref<1x128xf32, #tpu.memory_space<vmem>>, %arg5: memref<304x128xbf16, #tpu.memory_space<vmem>>, %arg6: memref<304x128xbf16, #tpu.memory_space<vmem>>, %arg7: memref<304x128xf32, #tpu.memory_space<vmem>>) attributes {dimension_semantics = [#tpu.dimension_semantics<arbitrary>], iteration_bounds = array<i64: 2>, scalar_prefetch = 0 : i64, scratch_operands = 1 : i64, tpu.core_type = #tpu.core_type<tc>, window_params = [{transform_indices = @transform_0, window_bounds = array<i64: 304, 128>}, {transform_indices = @transform_1, window_bounds = array<i64: 128, 128>}, {pipeline_mode = #tpu.pipeline_mode<synchronous>, transform_indices = @transform_2, window_bounds = array<i64: 1, 128>}, {pipeline_mode = #tpu.pipeline_mode<synchronous>, transform_indices = @transform_3, window_bounds = array<i64: 1, 128>}, {pipeline_mode = #tpu.pipeline_mode<synchronous>, transform_indices = @transform_4, window_bounds = array<i64: 304, 128>}, {pipeline_mode = #tpu.pipeline_mode<synchronous>, transform_indices = @transform_5, window_bounds = array<i64: 304, 128>}]} {
    %c0_i32 = arith.constant 0 : i32
    %0 = arith.cmpi eq, %arg0, %c0_i32 : i32
    %1 = arith.extui %0 : i1 to i32
    %c0_i32_0 = arith.constant 0 : i32
    %2 = arith.cmpi ne, %1, %c0_i32_0 : i32
    scf.if %2 {
      %cst_9 = arith.constant 0.000000e+00 : f32
      %12 = vector.broadcast %cst_9 : f32 to vector<304x128xf32>
      %c0_10 = arith.constant 0 : index
      %c0_11 = arith.constant 0 : index
      %13 = vector.load %arg7[%c0_10, %c0_11] : memref<304x128xf32, #tpu.memory_space<vmem>>, vector<304x128xf32>
      tpu.vector_store %arg7[%c0_10, %c0_11], %12 {strides = array<i32>} : memref<304x128xf32, #tpu.memory_space<vmem>>, vector<304x128xf32>,
    } else {
    }
    %c0 = arith.constant 0 : index
    %c0_1 = arith.constant 0 : index
    %3 = vector.load %arg7[%c0, %c0_1] : memref<304x128xf32, #tpu.memory_space<vmem>>, vector<304x128xf32>
    %c0_2 = arith.constant 0 : index
    %c0_3 = arith.constant 0 : index
    %4 = vector.load %arg1[%c0_2, %c0_3] : memref<304x128xbf16, #tpu.memory_space<vmem>>, vector<304x128xbf16>
    %c0_4 = arith.constant 0 : index
    %c0_5 = arith.constant 0 : index
    %5 = vector.load %arg2[%c0_4, %c0_5] : memref<128x128xbf16, #tpu.memory_space<vmem>>, vector<128x128xbf16>
    %cst = arith.constant dense<0.000000e+00> : vector<304x128xf32>
    %6 = tpu.matmul %4, %5, %cst {dimension_numbers = #tpu.dot_dimension_numbers<[1], [0], [0], [1], [0, 0, 1, 1], [], []>} : vector<304x128xbf16>, vector<128x128xbf16>, vector<304x128xf32> -> vector<304x128xf32>
    %7 = arith.addf %3, %6 : vector<304x128xf32>
    %c0_6 = arith.constant 0 : index
    %c0_7 = arith.constant 0 : index
    %8 = vector.load %arg7[%c0_6, %c0_7] : memref<304x128xf32, #tpu.memory_space<vmem>>, vector<304x128xf32>
    tpu.vector_store %arg7[%c0_6, %c0_7], %7 {strides = array<i32>} : memref<304x128xf32, #tpu.memory_space<vmem>>, vector<304x128xf32>,
    %c1_i32 = arith.constant 1 : i32
    %9 = arith.cmpi eq, %arg0, %c1_i32 : i32
    %10 = arith.extui %9 : i1 to i32
    %c0_i32_8 = arith.constant 0 : i32
    %11 = arith.cmpi ne, %10, %c0_i32_8 : i32
    scf.if %11 {
      %c0_9 = arith.constant 0 : index
      %c0_10 = arith.constant 0 : index
      %12 = vector.load %arg7[%c0_9, %c0_10] : memref<304x128xf32, #tpu.memory_space<vmem>>, vector<304x128xf32>
      %13 = tpu.iota {dimensions = array<i32: 0>} : vector<304x128xi32>
      %c300_i32 = arith.constant 300 : i32
      %14 = vector.broadcast %c300_i32 : i32 to vector<304x128xi32>
      %15 = arith.cmpi slt, %13, %14 : vector<304x128xi32>
      %16 = arith.extui %15 : vector<304x128xi1> to vector<304x128xi32>
      %17 = arith.sitofp %16 : vector<304x128xi32> to vector<304x128xf32>
      %cst_11 = arith.constant dense<0.000000e+00> : vector<128xf32>
      %18 = vector.multi_reduction <add>, %12, %cst_11 [0] : vector<304x128xf32> to vector<128xf32>
      %19 = vector.shape_cast %18 : vector<128xf32> to vector<1x128xf32>
      %cst_12 = arith.constant 0.00333333341 : f32
      %20 = vector.broadcast %cst_12 : f32 to vector<1x128xf32>
      %21 = arith.mulf %19, %20 : vector<1x128xf32>
      %22 = vector.broadcast %21 : vector<1x128xf32> to vector<304x128xf32>
      %23 = arith.subf %12, %22 : vector<304x128xf32>
      %24 = arith.mulf %23, %17 : vector<304x128xf32>
      %25 = arith.mulf %24, %24 : vector<304x128xf32>
      %cst_13 = arith.constant dense<0.000000e+00> : vector<128xf32>
      %26 = vector.multi_reduction <add>, %25, %cst_13 [0] : vector<304x128xf32> to vector<128xf32>
      %27 = vector.shape_cast %26 : vector<128xf32> to vector<1x128xf32>
      %cst_14 = arith.constant 0.00333333341 : f32
      %28 = vector.broadcast %cst_14 : f32 to vector<1x128xf32>
      %29 = arith.mulf %27, %28 : vector<1x128xf32>
      %cst_15 = arith.constant 9.99999974E-6 : f32
      %30 = vector.broadcast %cst_15 : f32 to vector<1x128xf32>
      %31 = arith.addf %29, %30 : vector<1x128xf32>
      %32 = math.rsqrt %31 : vector<1x128xf32>
      %c0_16 = arith.constant 0 : index
      %c0_17 = arith.constant 0 : index
      %33 = vector.load %arg3[%c0_16, %c0_17] : memref<1x128xf32, #tpu.memory_space<vmem>>, vector<1x128xf32>
      %34 = arith.mulf %32, %33 : vector<1x128xf32>
      %35 = vector.broadcast %34 : vector<1x128xf32> to vector<304x128xf32>
      %36 = arith.mulf %24, %35 : vector<304x128xf32>
      %c0_18 = arith.constant 0 : index
      %c0_19 = arith.constant 0 : index
      %37 = vector.load %arg4[%c0_18, %c0_19] : memref<1x128xf32, #tpu.memory_space<vmem>>, vector<1x128xf32>
      %38 = vector.broadcast %37 : vector<1x128xf32> to vector<304x128xf32>
      %39 = arith.addf %36, %38 : vector<304x128xf32>
      %c0_20 = arith.constant 0 : index
      %c0_21 = arith.constant 0 : index
      %40 = vector.load %arg5[%c0_20, %c0_21] : memref<304x128xbf16, #tpu.memory_space<vmem>>, vector<304x128xbf16>
      %41 = arith.extf %40 : vector<304x128xbf16> to vector<304x128xf32>
      %42 = arith.addf %39, %41 : vector<304x128xf32>
      %cst_22 = arith.constant 0.000000e+00 : f32
      %43 = vector.broadcast %cst_22 : f32 to vector<304x128xf32>
      %44 = arith.maximumf %42, %43 : vector<304x128xf32>
      %45 = arith.truncf %44 : vector<304x128xf32> to vector<304x128xbf16>
      %c0_23 = arith.constant 0 : index
      %c0_24 = arith.constant 0 : index
      %46 = vector.load %arg6[%c0_23, %c0_24] : memref<304x128xbf16, #tpu.memory_space<vmem>>, vector<304x128xbf16>
      tpu.vector_store %arg6[%c0_23, %c0_24], %45 {strides = array<i32>} : memref<304x128xbf16, #tpu.memory_space<vmem>>, vector<304x128xbf16>,
    } else {
    }
    return
  }
  func.func @transform_0(%arg0: i32) -> (i32, i32) {
    %c0_i32 = arith.constant 0 : i32
    %c0_i32_0 = arith.constant 0 : i32
    return %c0_i32, %arg0 : i32, i32
  }
  func.func @transform_1(%arg0: i32) -> (i32, i32) {
    %c0_i32 = arith.constant 0 : i32
    %c0_i32_0 = arith.constant 0 : i32
    return %arg0, %c0_i32 : i32, i32
  }
  func.func @transform_2(%arg0: i32) -> (i32, i32) {
    %c0_i32 = arith.constant 0 : i32
    %c0_i32_0 = arith.constant 0 : i32
    %c0_i32_1 = arith.constant 0 : i32
    return %c0_i32, %c0_i32_0 : i32, i32
  }
  func.func @transform_3(%arg0: i32) -> (i32, i32) {
    %c0_i32 = arith.constant 0 : i32
    %c0_i32_0 = arith.constant 0 : i32
    %c0_i32_1 = arith.constant 0 : i32
    return %c0_i32, %c0_i32_0 : i32, i32
  }
  func.func @transform_4(%arg0: i32) -> (i32, i32) {
    %c0_i32 = arith.constant 0 : i32
    %c0_i32_0 = arith.constant 0 : i32
    %c0_i32_1 = arith.constant 0 : i32
    return %c0_i32, %c0_i32_0 : i32, i32
  }
  func.func @transform_5(%arg0: i32) -> (i32, i32) {
    %c0_i32 = arith.constant 0 : i32
    %c0_i32_0 = arith.constant 0 : i32
    %c0_i32_1 = arith.constant 0 : i32
    return %c0_i32, %c0_i32_0 : i32, i32
  }
}

</mosaic_0001>

<bundles_post_ra>
// kernel: tpu_custom_call.1
= control target key start
LH: loop header
LB: loop body
LE: loop exit
PB: predicated region body
PF: predicated region fallthrough
CT: control target
= control target key end

     0   :  { %10 = vsyncpa [#allocation4], 0  ;;  %s3458_s0 = inlined_call_operand.hbm [shape: bf16[304,256], index: 0, kind: input, shape index: {}]   ;;  %s3459_s1 = inlined_call_operand.hbm [shape: bf16[256,128], index: 1, kind: input, shape index: {}]   ;;  %s3460_s2 = inlined_call_operand.vmem [shape: f32[1,128], index: 2, kind: input, shape index: {}]   ;;  %s3461_s3 = inlined_call_operand.vmem [shape: f32[1,128], index: 3, kind: input, shape index: {}]   ;;  %s3462_s4 = inlined_call_operand.hbm [shape: bf16[304,128], index: 4, kind: input, shape index: {}]   ;;  %s3463_s5 = inlined_call_operand.hbm [shape: bf16[304,128], index: 5, kind: output, shape index: {}]  }
   0x1   :  { %12 = vsyncpa [#allocation4 + $0x1], 0 }
   0x2   :  { %13 = vsyncpa [#allocation7], 0 }
   0x3   :  { %15 = vsyncpa [#allocation7 + $0x1], 0 }
   0x4   :  { %16 = vsyncpa [#allocation5], 0  ;;  %s2536_s18 = smov 0   ;;  %s2538_s19 = smov 0  }
   0x5   :  { %s2540_s20 = smov 0   ;;  %s2542_s21 = smov 0  }
   0x6 LB: > { %s2555_s22 = sadd.s32 4294967295, %s2491_s21   ;;  %s2558_s23 = sadd.s32 1, %s2491_s21   ;;  %s2491_s21 = sphi %s2542_s21, %s3560_s21   ;;  %s2487_s20 = sphi %s2540_s20, %s3559_s20   ;;  %s2483_s19 = sphi %s2538_s19, %s3558_s19   ;;  %s2479_s18 = sphi %s2536_s18, %s3557_s18  }
   0x7   : > { %s26_s24 = ssub.s32 %s2491_s21, %s2558_s23  ;;  %s29_s25 = sadd.s32 1, %s2487_s20 }
   0x8   : > { %p27_p0 = scmp.eq.s32.totalorder %s26_s24, 0  ;;  %p36_p1 = scmp.ne.s32.totalorder %s2487_s20, %s2483_s19 }
   0x9   : > { %p37_p2 = scmp.eq.s32.totalorder %s2491_s21, 0  ;;  %p42_p3 = scmp.ne.s32.totalorder %s2483_s19, %s2479_s18 }
   0xa   : > { %s2568_s26 = scalar_select %p27_p0, %s2487_s20, %s29_s25  }
   0xb   : > { %p2570_p4 = por %p37_p2, %p36_p1  ;;  %p3464_p5 = scmp.eq.s32.totalorder %s2555_s22, 0 }
   0xc   : > { %3484 = sst [smem:[#allocation14_spill]] %s2568_s26  ;;  %p1765_p6 = scmp.ge.s32.totalorder %s2491_s21, 1 }
   0xd   : > { %p163_p7 = scmp.lt.s32.totalorder %s2491_s21, 3  ;;  %p2579_p8 = por %p3464_p5, %p42_p3 }
   0xe   : > { %s2493_s30 = smov [#allocation8]   ;;  %p2255_p13 = scmp.lt.s32.totalorder %s2491_s21, 2 }
   0xf   : > { %s3486_s28 = scalar_select %p2579_p8, 1, 0 }
  0x10   : > { %p2584_p10 = pnand %p1765_p6, %p163_p7  ;;  %s181_s6 = sshll.u32 %s2493_s30, 4  ;;  %s182_s6 = int_to_ptr.vmem [resolvable:$true] %s181_s6 }
  0x11   : > { %s2598_s8 = sand.u32 1, %s2487_s20   ;;  %s1768_s9 = sshll.u32 %s2491_s21, 6 }
  0x12   : > { %s3487_s29 = scalar_select %p2584_p10, 1, 0 }
  0x13   : > { %p2243_p11 = pneg %p2584_p10  ;;  %p2603_p0 = pnand %p2255_p13, %p2570_p4 }
  0x14   : > { %s2331_s13 = scalar_lea.hbm %s3462_s4, 2432 }
  0x15   : > { %p2592_p12 = pnand %p2243_p11, %p3464_p5  ;;  %p2332_p1 = scmp.ne.s32.totalorder %s3462_s4, %s2331_s13 }
  0x16   : > { %s3489_s10 = scalar_select %p2603_p0, 1, 0 }
  0x17   : > { %p2333_p2 = pneg %p2592_p12  ;;  %p2338_p7 = scmp.lt.u32.totalorder %s2331_s13, %s3462_s4 }
  0x19   : > { %p2334_p3 = pnand %p2333_p2, %p2332_p1 }
  0x1b   : > { %p2335_p6 = pneg %p2334_p3 }
  0x1d   : > { %p2340_p4 = pnand %p2338_p7, %p2335_p6 }
  0x1f   : > { %2343 = shalt.err (!%p2340_p4)
}
  0x20   : > { %s2344_s18 = scalar_lea.vmem %s182_s6, 2432  ;;  %p2352_p5 = scmp.lt.s32.totalorder %s182_s6, %s182_s6 }
  0x21   : > { %p2345_p11 = scmp.ne.s32.totalorder %s182_s6, %s2344_s18  ;;  %p2353_p8 = scmp.lt.s32.totalorder %s2344_s18, %s2344_s18 }
  0x23   : > { %p2347_p13 = pnand %p2345_p11, %p2333_p2  ;;  %p2354_p10 = por %p2353_p8, %p2352_p5 }
  0x25   : > { %p2348_p9 = pneg %p2347_p13 }
  0x27   : > { %p2355_p0 = pnand %p2354_p10, %p2348_p9 }
  0x29   : > { %2358 = shalt.err (!%p2355_p0)
}
  0x2a   : > { %s2494_s24 = smov 64   ;;  %s2495_s25 = smov 4  }
  0x2b   : > { %2246 = dma.hbm_to_vmem [thread:$0]  (!%p2592_p12), %s3462_s4, 2432, %s182_s6, [#allocation7], %s2494_s24, %s2494_s24, %s2495_s25  }
  0x2c   : > { %s2229_s11 = smul.u32 152, %s2598_s8  ;;  %s2630_s14 = scalar_lea.hbm %s3458_s0, %s1768_s9 }
  0x2d   : > { %s215_s15 = sand.u32 1, %s2491_s21   ;;  %s1769_s17 = sshll.u32 %s2598_s8, 6 }
  0x2e   : > { %s199_s16 = scalar_lea.vmem [#allocation3], %s2229_s11  ;;  %s196_s18 = scalar_lea.sflag [#allocation4], %s2598_s8 }
  0x2f   : > { %s205_s7 = sshll.u32 %s199_s16, 4  ;;  %s2359_s26 = scalar_lea.hbm %s2630_s14, 2432  ;;  %s2634_s7 = int_to_ptr.vmem [resolvable:$true] %s205_s7 }
  0x30   : > { %p2360_p5 = scmp.ne.s32.totalorder %s2630_s14, %s2359_s26  ;;  %p3490_p8 = scmp.ne.s32.totalorder %s3489_s10, 0 }
  0x31   : > { %s2364_s27 = scalar_lea.hbm %s3458_s0, 4864  ;;  %p2365_p0 = scmp.lt.u32.totalorder %s2630_s14, %s3458_s0 }
  0x32   : > { %p2361_p9 = pneg %p3490_p8  ;;  %p2366_p1 = scmp.lt.u32.totalorder %s2364_s27, %s2359_s26 }
  0x33   : > { %p2368_p3 = scmp.lt.u32.totalorder %s2359_s26, %s2630_s14 }
  0x34   : > { %p2362_p10 = pnand %p2361_p9, %p2360_p5  ;;  %p2367_p2 = por %p2366_p1, %p2365_p0 }
  0x36   : > { %p2363_p12 = pneg %p2362_p10  ;;  %p2369_p6 = por %p2368_p3, %p2367_p2 }
  0x38   : > { %p2370_p7 = pnand %p2369_p6, %p2363_p12 }
  0x3a   : > { %2373 = shalt.err (!%p2370_p7)
}
  0x3b   : > { %s2374_s11 = scalar_lea.vmem %s2634_s7, 2432  ;;  %s2496_s13 = smov [#allocation3]  }
  0x3c   : > { %p2375_p4 = scmp.ne.s32.totalorder %s2634_s7, %s2374_s11  ;;  %s2379_s16 = sshll.u32 %s2496_s13, 4  ;;  %s2380_s16 = int_to_ptr.vmem [resolvable:$false] %s2379_s16 }
  0x3d   : > { %s2381_s6 = scalar_lea.vmem %s2380_s16, 4864  ;;  %p2382_p5 = scmp.lt.s32.totalorder %s2634_s7, %s2380_s16 }
  0x3e   : > { %p2377_p11 = pnand %p2375_p4, %p2361_p9  ;;  %p2383_p10 = scmp.lt.s32.totalorder %s2381_s6, %s2374_s11 }
  0x40   : > { %p2378_p13 = pneg %p2377_p11  ;;  %p2384_p0 = por %p2383_p10, %p2382_p5 }
  0x42   : > { %p2385_p1 = pnand %p2384_p0, %p2378_p13 }
  0x44   : > { %2388 = shalt.err (!%p2385_p1)
}
  0x45   : > { %s2497_s26 = smov 128   ;;  %s1848_s9 = sshll.u32 %s2491_s21, 10 }
  0x46   : > { %2250 = dma.hbm_to_vmem [thread:$0]  (!%p3490_p8), %s2630_s14, 2432, %s2634_s7, %s196_s18, %s2497_s26, %s2494_s24, %s2495_s25  }
  0x47   : > { %s219_s27 = scalar_lea.vmem [#allocation6], %s1769_s17  ;;  %s2672_s13 = scalar_lea.hbm %s3459_s1, %s1848_s9 }
  0x48   : > { %s226_s30 = sshll.u32 %s219_s27, 4  ;;  %s2678_s16 = scalar_lea.sflag [#allocation7], %s215_s15  ;;  %s2674_s30 = int_to_ptr.vmem [resolvable:$true] %s226_s30 }
  0x49   : > { %s2389_s6 = scalar_lea.hbm %s2672_s13, 1024  ;;  %s2394_s7 = scalar_lea.hbm %s3459_s1, 2048 }
  0x4a   : > { %p2390_p12 = scmp.ne.s32.totalorder %s2672_s13, %s2389_s6  ;;  %p2395_p6 = scmp.lt.u32.totalorder %s2672_s13, %s3459_s1 }
  0x4b   : > { %p2396_p7 = scmp.lt.u32.totalorder %s2394_s7, %s2389_s6  ;;  %p2398_p11 = scmp.lt.u32.totalorder %s2389_s6, %s2672_s13 }
  0x4c   : > { %p2392_p2 = pnand %p2390_p12, %p2361_p9 }
  0x4d   : > { %p2397_p4 = por %p2396_p7, %p2395_p6 }
  0x4e   : > { %p2393_p3 = pneg %p2392_p2 }
  0x4f   : > { %p2399_p13 = por %p2398_p11, %p2397_p4 }
  0x51   : > { %p2400_p5 = pnand %p2399_p13, %p2393_p3 }
  0x53   : > { %2403 = shalt.err (!%p2400_p5)
}
  0x54   : > { %s2404_s21 = scalar_lea.vmem %s2674_s30, 1024  ;;  %s2498_s15 = smov [#allocation6]  }
  0x55   : > { %p2405_p10 = scmp.ne.s32.totalorder %s2674_s30, %s2404_s21  ;;  %s2409_s26 = sshll.u32 %s2498_s15, 4  ;;  %s2410_s26 = int_to_ptr.vmem [resolvable:$false] %s2409_s26 }
  0x56   : > { %s2411_s9 = scalar_lea.vmem %s2410_s26, 2048  ;;  %p2412_p12 = scmp.lt.s32.totalorder %s2674_s30, %s2410_s26 }
  0x57   : > { %p2407_p0 = pnand %p2405_p10, %p2361_p9  ;;  %p2413_p2 = scmp.lt.s32.totalorder %s2411_s9, %s2404_s21 }
  0x59   : > { %p2408_p1 = pneg %p2407_p0  ;;  %p2414_p6 = por %p2413_p2, %p2412_p12 }
  0x5b   : > { %p2415_p7 = pnand %p2414_p6, %p2408_p1 }
  0x5d   : > { %2418 = shalt.err (!%p2415_p7)
}
  0x5e   : > { %2253 = dma.hbm_to_vmem [thread:$0]  (!%p3490_p8), %s2672_s13, 1024, %s2674_s30, %s2678_s16, %s2494_s24, %s2494_s24, %s2495_s25  }
  0x5f   : > { %p3491_p9 = scmp.ne.s32.totalorder %s3487_s29, 0 }
  0x60   : > { %s240_s27 = sand.u32 (!%p3491_p9), 1, %s2483_s19   ;;  %p3492_p3 = scmp.ne.s32.totalorder (!%p3491_p9), %s3486_s28, 0 }
  0x61   : > { %238 = sbr.rel (%p3491_p9) target bundleno = 737 (0x2e1), region = 40  ;;  %s241_s11 = scalar_lea.sflag (!%p3491_p9), [#allocation4], %s240_s27 }
  0x62   : > { %s2230_s12 = smul.u32 (!%p3491_p9), 152, %s240_s27 }
  0x64   : > { %s2710_s6 = scalar_lea.vmem (!%p3491_p9), [#allocation3], %s2230_s12 }
  0x68   : > { %2462 = dma.done.wait (%p3492_p3), %s241_s11, 2432  }
  0x69   : > { %2464 = vsyncadd (%p3492_p3), %s241_s11, 4294964864  ;;  %s249_s10 = sand.u32 1, %s2555_s22   ;;  %s1773_s8 = sshll.u32 %s240_s27, 6 }
  0x6a   : > { %s250_s24 = scalar_lea.sflag [#allocation7], %s249_s10  ;;  %s2717_s25 = scalar_lea.vmem [#allocation6], %s1773_s8 }
  0x6b   : > { %2466 = dma.done.wait (%p3492_p3), %s250_s24, 1024  }
  0x6c   : > { %2468 = vsyncadd (%p3492_p3), %s250_s24, 4294966272  ;;  %p3493_p8 = scmp.eq.s32.totalorder %s2555_s22, 0 }
  0x6e   : > { %2470 = dma.done.wait (%p3493_p8), [#allocation7], 2432   ;;  %p3494_p4 = pmov %p3493_p8 }
  0x6f   : > { %p3495_p11 = scmp.ne.s32.totalorder %s2555_s22, 0 }
  0x70   : > { %2472 = vsyncadd (%p3494_p4), [#allocation7], 4294964864  ;;  %v2499_v0 = vmov (!%p3495_p11), 0.0  }
  0x71   : > { %289 = sbr.rel (%p3495_p11) target bundleno = 132 (0x84), region = 56  ;;  %290 = vst [vmem:[#allocation2] sm:$0xff] (!%p3495_p11), %v2499_v0  ;;  %291 = vst [vmem:[#allocation2 + $0x8] sm:$0xff] (!%p3495_p11), %v2499_v0 }
  0x72   : > { %292 = vst [vmem:[#allocation2 + $0x10] sm:$0xff] (!%p3495_p11), %v2499_v0  ;;  %293 = vst [vmem:[#allocation2 + $0x18] sm:$0xff] (!%p3495_p11), %v2499_v0 }
  0x73   : > { %294 = vst [vmem:[#allocation2 + $0x20] sm:$0xff] (!%p3495_p11), %v2499_v0  ;;  %295 = vst [vmem:[#allocation2 + $0x28] sm:$0xff] (!%p3495_p11), %v2499_v0 }
  0x74   : > { %296 = vst [vmem:[#allocation2 + $0x30] sm:$0xff] (!%p3495_p11), %v2499_v0  ;;  %297 = vst [vmem:[#allocation2 + $0x38] sm:$0xff] (!%p3495_p11), %v2499_v0 }
  0x75   : > { %298 = vst [vmem:[#allocation2 + $0x40] sm:$0xff] (!%p3495_p11), %v2499_v0  ;;  %299 = vst [vmem:[#allocation2 + $0x48] sm:$0xff] (!%p3495_p11), %v2499_v0 }
  0x76   : > { %300 = vst [vmem:[#allocation2 + $0x50] sm:$0xff] (!%p3495_p11), %v2499_v0  ;;  %301 = vst [vmem:[#allocation2 + $0x58] sm:$0xff] (!%p3495_p11), %v2499_v0 }
  0x77   : > { %302 = vst [vmem:[#allocation2 + $0x60] sm:$0xff] (!%p3495_p11), %v2499_v0  ;;  %303 = vst [vmem:[#allocation2 + $0x68] sm:$0xff] (!%p3495_p11), %v2499_v0 }
  0x78   : > { %304 = vst [vmem:[#allocation2 + $0x70] sm:$0xff] %v2499_v0  ;;  %305 = vst [vmem:[#allocation2 + $0x78] sm:$0xff] %v2499_v0 }
  0x79   : > { %306 = vst [vmem:[#allocation2 + $0x80] sm:$0xff] %v2499_v0  ;;  %307 = vst [vmem:[#allocation2 + $0x88] sm:$0xff] %v2499_v0 }
  0x7a   : > { %308 = vst [vmem:[#allocation2 + $0x90] sm:$0xff] %v2499_v0  ;;  %309 = vst [vmem:[#allocation2 + $0x98] sm:$0xff] %v2499_v0 }
  0x7b   : > { %310 = vst [vmem:[#allocation2 + $0xa0] sm:$0xff] %v2499_v0  ;;  %311 = vst [vmem:[#allocation2 + $0xa8] sm:$0xff] %v2499_v0 }
  0x7c   : > { %312 = vst [vmem:[#allocation2 + $0xb0] sm:$0xff] %v2499_v0  ;;  %313 = vst [vmem:[#allocation2 + $0xb8] sm:$0xff] %v2499_v0 }
  0x7d   : > { %314 = vst [vmem:[#allocation2 + $0xc0] sm:$0xff] %v2499_v0  ;;  %315 = vst [vmem:[#allocation2 + $0xc8] sm:$0xff] %v2499_v0 }
  0x7e   : > { %316 = vst [vmem:[#allocation2 + $0xd0] sm:$0xff] %v2499_v0  ;;  %317 = vst [vmem:[#allocation2 + $0xd8] sm:$0xff] %v2499_v0 }
  0x7f   : > { %318 = vst [vmem:[#allocation2 + $0xe0] sm:$0xff] %v2499_v0  ;;  %319 = vst [vmem:[#allocation2 + $0xe8] sm:$0xff] %v2499_v0 }
  0x80   : > { %320 = vst [vmem:[#allocation2 + $0xf0] sm:$0xff] %v2499_v0  ;;  %321 = vst [vmem:[#allocation2 + $0xf8] sm:$0xff] %v2499_v0 }
  0x81   : > { %322 = vst [vmem:[#allocation2 + $0x100] sm:$0xff] %v2499_v0  ;;  %323 = vst [vmem:[#allocation2 + $0x108] sm:$0xff] %v2499_v0 }
  0x82   : > { %324 = vst [vmem:[#allocation2 + $0x110] sm:$0xff] %v2499_v0  ;;  %325 = vst [vmem:[#allocation2 + $0x118] sm:$0xff] %v2499_v0 }
  0x83   : > { %326 = vst [vmem:[#allocation2 + $0x120] sm:$0xff] %v2499_v0  ;;  %327 = vst [vmem:[#allocation2 + $0x128] sm:$0xff] %v2499_v0 }
  0x84 PF: > { %v2302_v1 = vld [vmem:[%s2717_s25] sm:$0xff]   ;;  %v2500_v2 = vmov 0.0   ;;  %v2303_v3 = vld [vmem:[%s2717_s25 + $0x8] sm:$0xff]   ;;  %vm2501_vm0 = vmmov 0   ;;  %v2304_v4 = vld [vmem:[%s2717_s25 + $0x10] sm:$0xff]   ;;  %p1803_p13 = scmp.ne.s32.totalorder %s2555_s22, 1 }
  0x85   : > { %2121 = vmatprep.subr.bf16.mxu0 %v2500_v2  ;;  %2213 = vmatprep.subr.bf16.mxu1 %v2500_v2  ;;  %v2305_v5 = vld [vmem:[%s2717_s25 + $0x18] sm:$0xff]   ;;  %v2306_v6 = vld [vmem:[%s2717_s25 + $0x20] sm:$0xff]   ;;  %v2307_v7 = vld [vmem:[%s2717_s25 + $0x28] sm:$0xff]  }
  0x86   : > { %2122 = vmatpush3.bf16.msra.mxu0 %v2302_v1  ;;  %2221 = vmatpush3.bf16.msra.mxu1 %v2302_v1  ;;  %v2308_v8 = vld [vmem:[%s2717_s25 + $0x30] sm:$0xff]   ;;  %v2309_v9 = vld [vmem:[%s2717_s25 + $0x38] sm:$0xff]   ;;  %v2313_v13 = vld [vmem:[%s2710_s6 + $0x58] sm:$0xff]  }
  0x87   : > { %2123 = vmatprep.subr.bf16.mxu0 %v2500_v2  ;;  %2214 = vmatprep.subr.bf16.mxu1 %v2500_v2  ;;  %v2310_v10 = vld [vmem:[%s2710_s6] sm:$0xff]   ;;  %v2311_v11 = vld [vmem:[%s2710_s6 + $0x50] sm:$0xff]   ;;  %v2312_v12 = vld [vmem:[%s2710_s6 + $0x8] sm:$0xff]  }
  0x88   : > { %2137 = vmatprep.mubr.msk.bf16.mxu0 %vm2501_vm0, %v2500_v2  ;;  %2177 = vmatprep.mubr.msk.bf16.mxu1 %vm2501_vm0, %v2500_v2  ;;  %v2314_v14 = vld [vmem:[%s2710_s6 + $0x10] sm:$0xff]   ;;  %v2315_v15 = vld [vmem:[%s2710_s6 + $0x60] sm:$0xff]   ;;  %v2316_v16 = vld [vmem:[%s2710_s6 + $0x18] sm:$0xff]  }
  0x89   : > { %v2317_v17 = vld [vmem:[%s2710_s6 + $0x68] sm:$0xff]   ;;  %v2318_v18 = vld [vmem:[%s2710_s6 + $0x20] sm:$0xff]   ;;  %v2319_v19 = vld [vmem:[%s2710_s6 + $0x70] sm:$0xff]  }
  0x8a   : > { %2124 = vmatpush3.bf16.msra.mxu0 %v2303_v3  ;;  %2222 = vmatpush3.bf16.msra.mxu1 %v2303_v3  ;;  %v2320_v20 = vld [vmem:[%s2710_s6 + $0x28] sm:$0xff]   ;;  %v2321_v21 = vld [vmem:[%s2710_s6 + $0x78] sm:$0xff]   ;;  %v2322_v22 = vld [vmem:[%s2710_s6 + $0x30] sm:$0xff]  }
  0x8b   : > { %2125 = vmatprep.subr.bf16.mxu0 %v2500_v2  ;;  %2215 = vmatprep.subr.bf16.mxu1 %v2500_v2  ;;  %v2323_v23 = vld [vmem:[%s2710_s6 + $0x80] sm:$0xff]   ;;  %v2324_v24 = vld [vmem:[%s2710_s6 + $0x38] sm:$0xff]   ;;  %v2325_v25 = vld [vmem:[%s2710_s6 + $0x88] sm:$0xff]  }
  0x8c   : > { %v2326_v26 = vld [vmem:[%s2710_s6 + $0x40] sm:$0xff]   ;;  %v2327_v27 = vld [vmem:[%s2710_s6 + $0x90] sm:$0xff]   ;;  %v2328_v28 = vld [vmem:[%s2710_s6 + $0x48] sm:$0xff]  }
  0x8d   : > { %v328_v29 = vld [vmem:[#allocation2] sm:$0xff]  ;;  %v329_v32 = vld [vmem:[#allocation2 + $0x8] sm:$0xff]  ;;  %v330_v45 = vld [vmem:[#allocation2 + $0x10] sm:$0xff] }
  0x8e   : > { %2126 = vmatpush3.bf16.msra.mxu0 %v2304_v4  ;;  %2223 = vmatpush3.bf16.msra.mxu1 %v2304_v4  ;;  %v348_v30 = vld [vmem:[#allocation2 + $0xa0] sm:$0xff]  ;;  %v349_v34 = vld [vmem:[#allocation2 + $0xa8] sm:$0xff]  ;;  %v350_v46 = vld [vmem:[#allocation2 + $0xb0] sm:$0xff] }
  0x8f   : > { %2127 = vmatprep.subr.bf16.mxu0 %v2500_v2  ;;  %2216 = vmatprep.subr.bf16.mxu1 %v2500_v2  ;;  %v331_v48 = vld [vmem:[#allocation2 + $0x18] sm:$0xff]  ;;  %v332_v61 = vld [vmem:[#allocation2 + $0x20] sm:$0xff]  ;;  %v333_v0 = vld [vmem:[#allocation2 + $0x28] sm:$0xff] }
  0x90   : > { %v351_v50 = vld [vmem:[#allocation2 + $0xb8] sm:$0xff]  ;;  %v352_v62 = vld [vmem:[#allocation2 + $0xc0] sm:$0xff] }
  0x92   : > { %2128 = vmatpush3.bf16.msra.mxu0 %v2305_v5  ;;  %2224 = vmatpush3.bf16.msra.mxu1 %v2305_v5 }
  0x93   : > { %2129 = vmatprep.subr.bf16.mxu0 %v2500_v2  ;;  %2217 = vmatprep.subr.bf16.mxu1 %v2500_v2 }
  0x96   : > { %2130 = vmatpush3.bf16.msra.mxu0 %v2306_v6  ;;  %2225 = vmatpush3.bf16.msra.mxu1 %v2306_v6 }
  0x97   : > { %2131 = vmatprep.subr.bf16.mxu0 %v2500_v2  ;;  %2218 = vmatprep.subr.bf16.mxu1 %v2500_v2 }
  0x9a   : > { %2132 = vmatpush3.bf16.msra.mxu0 %v2307_v7  ;;  %2226 = vmatpush3.bf16.msra.mxu1 %v2307_v7 }
  0x9b   : > { %2133 = vmatprep.subr.bf16.mxu0 %v2500_v2  ;;  %2219 = vmatprep.subr.bf16.mxu1 %v2500_v2 }
  0x9e   : > { %2134 = vmatpush3.bf16.msra.mxu0 %v2308_v8  ;;  %2227 = vmatpush3.bf16.msra.mxu1 %v2308_v8 }
  0x9f   : > { %2135 = vmatprep.subr.bf16.mxu0 %v2500_v2  ;;  %2220 = vmatprep.subr.bf16.mxu1 %v2500_v2 }
  0xa2   : > { %2136 = vmatpush3.bf16.msra.mxu0 %v2309_v9  ;;  %2228 = vmatpush3.bf16.msra.mxu1 %v2309_v9 }
  0xa5   : > { %2138 = vmatmul.mubr.bf16.vlgmr.msra.gmra.mrb[0].mxu0 %v2310_v10  ;;  %2178 = vmatmul.mubr.bf16.vlgmr.msra.gmra.mrb[0].mxu1 %v2311_v11 }
  0xa6   : > { %2141 = vmatprep.mubr.msk.bf16.mxu0 %vm2501_vm0, %v2500_v2  ;;  %2181 = vmatprep.mubr.msk.bf16.mxu1 %vm2501_vm0, %v2500_v2 }
  0xad   : > { %2142 = vmatmul.mubr.bf16.gmra.mrb[4].mxu0 %v2312_v12  ;;  %2182 = vmatmul.mubr.bf16.gmra.mrb[4].mxu1 %v2313_v13  ;;  %v334_v13 = vld [vmem:[#allocation2 + $0x30] sm:$0xff] }
  0xae   : > { %2145 = vmatprep.mubr.msk.bf16.mxu0 %vm2501_vm0, %v2500_v2  ;;  %2185 = vmatprep.mubr.msk.bf16.mxu1 %vm2501_vm0, %v2500_v2 }
  0xb5   : > { %2146 = vmatmul.mubr.bf16.gmra.mrb[8].mxu0 %v2314_v14  ;;  %2186 = vmatmul.mubr.bf16.gmra.mrb[8].mxu1 %v2315_v15  ;;  %v354_v14 = vld [vmem:[#allocation2 + $0xd0] sm:$0xff] }
  0xb6   : > { %2149 = vmatprep.mubr.msk.bf16.mxu0 %vm2501_vm0, %v2500_v2  ;;  %2189 = vmatprep.mubr.msk.bf16.mxu1 %vm2501_vm0, %v2500_v2 }
  0xbd   : > { %2150 = vmatmul.mubr.bf16.gmra.mrb[12].mxu0 %v2316_v16  ;;  %2190 = vmatmul.mubr.bf16.gmra.mrb[12].mxu1 %v2317_v17  ;;  %v335_v16 = vld [vmem:[#allocation2 + $0x38] sm:$0xff] }
  0xbe   : > { %2153 = vmatprep.mubr.msk.bf16.mxu0 %vm2501_vm0, %v2500_v2  ;;  %2193 = vmatprep.mubr.msk.bf16.mxu1 %vm2501_vm0, %v2500_v2 }
  0xc5   : > { %2154 = vmatmul.mubr.bf16.gmra.mrb[16].mxu0 %v2318_v18  ;;  %2194 = vmatmul.mubr.bf16.gmra.mrb[16].mxu1 %v2319_v19  ;;  %v355_v18 = vld [vmem:[#allocation2 + $0xd8] sm:$0xff] }
  0xc6   : > { %2157 = vmatprep.mubr.msk.bf16.mxu0 %vm2501_vm0, %v2500_v2  ;;  %2197 = vmatprep.mubr.msk.bf16.mxu1 %vm2501_vm0, %v2500_v2 }
  0xcd   : > { %2158 = vmatmul.mubr.bf16.gmra.mrb[20].mxu0 %v2320_v20  ;;  %2198 = vmatmul.mubr.bf16.gmra.mrb[20].mxu1 %v2321_v21 }
  0xce   : > { %2161 = vmatprep.mubr.msk.bf16.mxu0 %vm2501_vm0, %v2500_v2  ;;  %2201 = vmatprep.mubr.msk.bf16.mxu1 %vm2501_vm0, %v2500_v2 }
  0xd5   : > { %2162 = vmatmul.mubr.bf16.gmra.mrb[24].mxu0 %v2322_v22  ;;  %2202 = vmatmul.mubr.bf16.gmra.mrb[24].mxu1 %v2323_v23 }
  0xd6   : > { %2165 = vmatprep.mubr.msk.bf16.mxu0 %vm2501_vm0, %v2500_v2  ;;  %2205 = vmatprep.mubr.msk.bf16.mxu1 %vm2501_vm0, %v2500_v2 }
  0xdd   : > { %2166 = vmatmul.mubr.bf16.gmra.mrb[28].mxu0 %v2324_v24  ;;  %2206 = vmatmul.mubr.bf16.gmra.mrb[28].mxu1 %v2325_v25 }
  0xde   : > { %2169 = vmatprep.mubr.msk.bf16.mxu0 %vm2501_vm0, %v2500_v2  ;;  %2209 = vmatprep.mubr.msk.bf16.mxu1 %vm2501_vm0, %v2500_v2 }
  0xe5   : > { %2170 = vmatmul.mubr.bf16.gmra.mrb[32].mxu0 %v2326_v26  ;;  %2210 = vmatmul.mubr.bf16.gmra.mrb[32].mxu1 %v2327_v27 }
  0xe6   : > { %2173 = vmatprep.mubr.msk.bf16.mxu0 %vm2501_vm0, %v2500_v2  ;;  %v353_v2 = vld [vmem:[#allocation2 + $0xc8] sm:$0xff] }
  0xed   : > { %2174 = vmatmul.mubr.bf16.gmra.mrb[36].mxu0 %v2328_v28 }
 0x178   : > { %v616_v31 = vpop.f32.mrb[0].mxu0  ;;  %v696_v33 = vpop.f32.mrb[0].mxu1 }
 0x179   : > { %v767_v35 = vadd.f32 %v616_v31, %v328_v29  ;;  %v2139_v36 = vpop.f32.mrb[1].mxu0  ;;  %v787_v37 = vadd.f32 %v696_v33, %v348_v30  ;;  %v2179_v38 = vpop.f32.mrb[1].mxu1  ;;  %v336_v29 = vld [vmem:[#allocation2 + $0x40] sm:$0xff] }
 0x17a   : > { %v619_v39 = vpop.f32.mrb[2].mxu0  ;;  %v699_v40 = vpop.f32.mrb[2].mxu1  ;;  %v356_v30 = vld [vmem:[#allocation2 + $0xe0] sm:$0xff] }
 0x17b   : > { %805 = vst [vmem:[#allocation2] sm:$0xff] %v767_v35  ;;  %v768_v41 = vadd.f32 %v619_v39, %v329_v32  ;;  %v2140_v42 = vpop.f32.mrb[3].mxu0  ;;  %825 = vst [vmem:[#allocation2 + $0xa0] sm:$0xff] %v787_v37  ;;  %v788_v43 = vadd.f32 %v699_v40, %v349_v34  ;;  %v2180_v44 = vpop.f32.mrb[3].mxu1  ;;  %v337_v32 = vld [vmem:[#allocation2 + $0x48] sm:$0xff] }
 0x17c   : > { %v357_v34 = vld [vmem:[#allocation2 + $0xe8] sm:$0xff] }
 0x17d   : > { %806 = vst [vmem:[#allocation2 + $0x8] sm:$0xff] %v768_v41  ;;  %826 = vst [vmem:[#allocation2 + $0xa8] sm:$0xff] %v788_v43 }
 0x180   : > { %v624_v47 = vpop.f32.mrb[4].mxu0  ;;  %v704_v49 = vpop.f32.mrb[4].mxu1 }
 0x181   : > { %v769_v51 = vadd.f32 %v624_v47, %v330_v45  ;;  %v2143_v52 = vpop.f32.mrb[5].mxu0  ;;  %v789_v53 = vadd.f32 %v704_v49, %v350_v46  ;;  %v2183_v54 = vpop.f32.mrb[5].mxu1  ;;  %v338_v45 = vld [vmem:[#allocation2 + $0x50] sm:$0xff] }
 0x182   : > { %v627_v55 = vpop.f32.mrb[6].mxu0  ;;  %v707_v56 = vpop.f32.mrb[6].mxu1  ;;  %v358_v46 = vld [vmem:[#allocation2 + $0xf0] sm:$0xff] }
 0x183   : > { %807 = vst [vmem:[#allocation2 + $0x10] sm:$0xff] %v769_v51  ;;  %v770_v57 = vadd.f32 %v627_v55, %v331_v48  ;;  %v2144_v58 = vpop.f32.mrb[7].mxu0  ;;  %827 = vst [vmem:[#allocation2 + $0xb0] sm:$0xff] %v789_v53  ;;  %v790_v59 = vadd.f32 %v707_v56, %v351_v50  ;;  %v2184_v60 = vpop.f32.mrb[7].mxu1  ;;  %v339_v48 = vld [vmem:[#allocation2 + $0x58] sm:$0xff] }
 0x184   : > { %v359_v50 = vld [vmem:[#allocation2 + $0xf8] sm:$0xff] }
 0x185   : > { %808 = vst [vmem:[#allocation2 + $0x18] sm:$0xff] %v770_v57  ;;  %828 = vst [vmem:[#allocation2 + $0xb8] sm:$0xff] %v790_v59 }
 0x188   : > { %v632_v63 = vpop.f32.mrb[8].mxu0  ;;  %v712_v1 = vpop.f32.mrb[8].mxu1 }
 0x189   : > { %v771_v3 = vadd.f32 %v632_v63, %v332_v61  ;;  %v2147_v4 = vpop.f32.mrb[9].mxu0  ;;  %v791_v5 = vadd.f32 %v712_v1, %v352_v62  ;;  %v2187_v6 = vpop.f32.mrb[9].mxu1  ;;  %v340_v61 = vld [vmem:[#allocation2 + $0x60] sm:$0xff] }
 0x18a   : > { %v635_v7 = vpop.f32.mrb[10].mxu0  ;;  %v715_v8 = vpop.f32.mrb[10].mxu1  ;;  %v360_v62 = vld [vmem:[#allocation2 + $0x100] sm:$0xff] }
 0x18b   : > { %809 = vst [vmem:[#allocation2 + $0x20] sm:$0xff] %v771_v3  ;;  %v772_v9 = vadd.f32 %v635_v7, %v333_v0  ;;  %v2148_v10 = vpop.f32.mrb[11].mxu0  ;;  %829 = vst [vmem:[#allocation2 + $0xc0] sm:$0xff] %v791_v5  ;;  %v792_v11 = vadd.f32 %v715_v8, %v353_v2  ;;  %v2188_v12 = vpop.f32.mrb[11].mxu1  ;;  %v341_v0 = vld [vmem:[#allocation2 + $0x68] sm:$0xff] }
 0x18c   : > { %v361_v2 = vld [vmem:[#allocation2 + $0x108] sm:$0xff] }
 0x18d   : > { %810 = vst [vmem:[#allocation2 + $0x28] sm:$0xff] %v772_v9  ;;  %830 = vst [vmem:[#allocation2 + $0xc8] sm:$0xff] %v792_v11 }
 0x190   : > { %v640_v15 = vpop.f32.mrb[12].mxu0  ;;  %v720_v17 = vpop.f32.mrb[12].mxu1 }
 0x191   : > { %v773_v19 = vadd.f32 %v640_v15, %v334_v13  ;;  %v2151_v20 = vpop.f32.mrb[13].mxu0  ;;  %v793_v21 = vadd.f32 %v720_v17, %v354_v14  ;;  %v2191_v22 = vpop.f32.mrb[13].mxu1  ;;  %v342_v13 = vld [vmem:[#allocation2 + $0x70] sm:$0xff] }
 0x192   : > { %v643_v23 = vpop.f32.mrb[14].mxu0  ;;  %v723_v24 = vpop.f32.mrb[14].mxu1  ;;  %v362_v14 = vld [vmem:[#allocation2 + $0x110] sm:$0xff] }
 0x193   : > { %811 = vst [vmem:[#allocation2 + $0x30] sm:$0xff] %v773_v19  ;;  %v774_v25 = vadd.f32 %v643_v23, %v335_v16  ;;  %v2152_v26 = vpop.f32.mrb[15].mxu0  ;;  %831 = vst [vmem:[#allocation2 + $0xd0] sm:$0xff] %v793_v21  ;;  %v794_v27 = vadd.f32 %v723_v24, %v355_v18  ;;  %v2192_v28 = vpop.f32.mrb[15].mxu1  ;;  %v343_v16 = vld [vmem:[#allocation2 + $0x78] sm:$0xff] }
 0x194   : > { %v363_v18 = vld [vmem:[#allocation2 + $0x118] sm:$0xff] }
 0x195   : > { %812 = vst [vmem:[#allocation2 + $0x38] sm:$0xff] %v774_v25  ;;  %832 = vst [vmem:[#allocation2 + $0xd8] sm:$0xff] %v794_v27 }
 0x198   : > { %v648_v31 = vpop.f32.mrb[16].mxu0  ;;  %v728_v33 = vpop.f32.mrb[16].mxu1 }
 0x199   : > { %v775_v35 = vadd.f32 %v648_v31, %v336_v29  ;;  %v2155_v36 = vpop.f32.mrb[17].mxu0  ;;  %v795_v37 = vadd.f32 %v728_v33, %v356_v30  ;;  %v2195_v38 = vpop.f32.mrb[17].mxu1  ;;  %v344_v29 = vld [vmem:[#allocation2 + $0x80] sm:$0xff] }
 0x19a   : > { %v651_v39 = vpop.f32.mrb[18].mxu0  ;;  %v731_v40 = vpop.f32.mrb[18].mxu1  ;;  %v364_v30 = vld [vmem:[#allocation2 + $0x120] sm:$0xff] }
 0x19b   : > { %813 = vst [vmem:[#allocation2 + $0x40] sm:$0xff] %v775_v35  ;;  %v776_v41 = vadd.f32 %v651_v39, %v337_v32  ;;  %v2156_v42 = vpop.f32.mrb[19].mxu0  ;;  %833 = vst [vmem:[#allocation2 + $0xe0] sm:$0xff] %v795_v37  ;;  %v796_v43 = vadd.f32 %v731_v40, %v357_v34  ;;  %v2196_v44 = vpop.f32.mrb[19].mxu1  ;;  %v345_v32 = vld [vmem:[#allocation2 + $0x88] sm:$0xff] }
 0x19c   : > { %v365_v34 = vld [vmem:[#allocation2 + $0x128] sm:$0xff] }
 0x19d   : > { %814 = vst [vmem:[#allocation2 + $0x48] sm:$0xff] %v776_v41  ;;  %834 = vst [vmem:[#allocation2 + $0xe8] sm:$0xff] %v796_v43 }
 0x1a0   : > { %v656_v47 = vpop.f32.mrb[20].mxu0  ;;  %v736_v49 = vpop.f32.mrb[20].mxu1 }
 0x1a1   : > { %v777_v51 = vadd.f32 %v656_v47, %v338_v45  ;;  %v2159_v52 = vpop.f32.mrb[21].mxu0  ;;  %v797_v53 = vadd.f32 %v736_v49, %v358_v46  ;;  %v2199_v54 = vpop.f32.mrb[21].mxu1  ;;  %v346_v45 = vld [vmem:[#allocation2 + $0x90] sm:$0xff]  ;;  %v347_v47 = vld [vmem:[#allocation2 + $0x98] sm:$0xff] }
 0x1a2   : > { %v659_v55 = vpop.f32.mrb[22].mxu0  ;;  %v739_v56 = vpop.f32.mrb[22].mxu1 }
 0x1a3   : > { %815 = vst [vmem:[#allocation2 + $0x50] sm:$0xff] %v777_v51  ;;  %v778_v57 = vadd.f32 %v659_v55, %v339_v48  ;;  %v2160_v58 = vpop.f32.mrb[23].mxu0  ;;  %835 = vst [vmem:[#allocation2 + $0xf0] sm:$0xff] %v797_v53  ;;  %v798_v59 = vadd.f32 %v739_v56, %v359_v50  ;;  %v2200_v60 = vpop.f32.mrb[23].mxu1 }
 0x1a5   : > { %816 = vst [vmem:[#allocation2 + $0x58] sm:$0xff] %v778_v57  ;;  %836 = vst [vmem:[#allocation2 + $0xf8] sm:$0xff] %v798_v59 }
 0x1a8   : > { %v664_v63 = vpop.f32.mrb[24].mxu0  ;;  %v744_v1 = vpop.f32.mrb[24].mxu1 }
 0x1a9   : > { %v779_v3 = vadd.f32 %v664_v63, %v340_v61  ;;  %v2163_v4 = vpop.f32.mrb[25].mxu0  ;;  %v799_v5 = vadd.f32 %v744_v1, %v360_v62  ;;  %v2203_v6 = vpop.f32.mrb[25].mxu1 }
 0x1aa   : > { %v667_v7 = vpop.f32.mrb[26].mxu0  ;;  %v747_v8 = vpop.f32.mrb[26].mxu1 }
 0x1ab   : > { %817 = vst [vmem:[#allocation2 + $0x60] sm:$0xff] %v779_v3  ;;  %v780_v9 = vadd.f32 %v667_v7, %v341_v0  ;;  %v2164_v10 = vpop.f32.mrb[27].mxu0  ;;  %837 = vst [vmem:[#allocation2 + $0x100] sm:$0xff] %v799_v5  ;;  %v800_v11 = vadd.f32 %v747_v8, %v361_v2  ;;  %v2204_v12 = vpop.f32.mrb[27].mxu1 }
 0x1ad   : > { %818 = vst [vmem:[#allocation2 + $0x68] sm:$0xff] %v780_v9  ;;  %838 = vst [vmem:[#allocation2 + $0x108] sm:$0xff] %v800_v11 }
 0x1b0   : > { %v672_v15 = vpop.f32.mrb[28].mxu0  ;;  %v752_v17 = vpop.f32.mrb[28].mxu1 }
 0x1b1   : > { %v781_v19 = vadd.f32 %v672_v15, %v342_v13  ;;  %v2167_v20 = vpop.f32.mrb[29].mxu0  ;;  %v801_v21 = vadd.f32 %v752_v17, %v362_v14  ;;  %v2207_v22 = vpop.f32.mrb[29].mxu1 }
 0x1b2   : > { %v675_v23 = vpop.f32.mrb[30].mxu0  ;;  %v755_v24 = vpop.f32.mrb[30].mxu1 }
 0x1b3   : > { %819 = vst [vmem:[#allocation2 + $0x70] sm:$0xff] %v781_v19  ;;  %v782_v25 = vadd.f32 %v675_v23, %v343_v16  ;;  %v2168_v26 = vpop.f32.mrb[31].mxu0  ;;  %839 = vst [vmem:[#allocation2 + $0x110] sm:$0xff] %v801_v21  ;;  %v802_v27 = vadd.f32 %v755_v24, %v363_v18  ;;  %v2208_v28 = vpop.f32.mrb[31].mxu1 }
 0x1b5   : > { %820 = vst [vmem:[#allocation2 + $0x78] sm:$0xff] %v782_v25  ;;  %840 = vst [vmem:[#allocation2 + $0x118] sm:$0xff] %v802_v27 }
 0x1b8   : > { %v680_v31 = vpop.f32.mrb[32].mxu0  ;;  %v760_v33 = vpop.f32.mrb[32].mxu1 }
 0x1b9   : > { %v783_v35 = vadd.f32 %v680_v31, %v344_v29  ;;  %v2171_v36 = vpop.f32.mrb[33].mxu0  ;;  %v803_v37 = vadd.f32 %v760_v33, %v364_v30  ;;  %v2211_v38 = vpop.f32.mrb[33].mxu1 }
 0x1ba   : > { %v683_v39 = vpop.f32.mrb[34].mxu0  ;;  %v763_v40 = vpop.f32.mrb[34].mxu1 }
 0x1bb   : > { %821 = vst [vmem:[#allocation2 + $0x80] sm:$0xff] %v783_v35  ;;  %v784_v41 = vadd.f32 %v683_v39, %v345_v32  ;;  %v2172_v42 = vpop.f32.mrb[35].mxu0  ;;  %841 = vst [vmem:[#allocation2 + $0x120] sm:$0xff] %v803_v37  ;;  %v804_v43 = vadd.f32 %v763_v40, %v365_v34  ;;  %v2212_v44 = vpop.f32.mrb[35].mxu1 }
 0x1bd   : > { %822 = vst [vmem:[#allocation2 + $0x88] sm:$0xff] %v784_v41  ;;  %842 = vst [vmem:[#allocation2 + $0x128] sm:$0xff] %v804_v43 }
 0x1bf   : > { %846 = sbr.rel (%p1803_p13) target bundleno = 711 (0x2c7), region = 60 }
 0x1c0   : > { %v688_v46 = vpop.f32.mrb[36].mxu0 }
 0x1c1   : > { %v785_v48 = vadd.f32 %v688_v46, %v346_v45  ;;  %v2175_v49 = vpop.f32.mrb[37].mxu0 }
 0x1c2   : > { %v691_v50 = vpop.f32.mrb[38].mxu0 }
 0x1c3   : > { %823 = vst [vmem:[#allocation2 + $0x90] sm:$0xff] %v785_v48  ;;  %v786_v51 = vadd.f32 %v691_v50, %v347_v47  ;;  %v2176_v52 = vpop.f32.mrb[39].mxu0 }
 0x1c5   : > { %824 = vst [vmem:[#allocation2 + $0x98] sm:$0xff] %v786_v51 }
 0x1c6   : > { %v2811_v53 = vld [vmem:[#allocation2] sm:$0xff]  ;;  %v2813_v54 = vld [vmem:[#allocation2 + $0x8] sm:$0xff]  ;;  %v2815_v55 = vld [vmem:[#allocation2 + $0x10] sm:$0xff] }
 0x1c7   : > { %v1038_v56 = vadd.f32 %v2813_v54, %v2811_v53  ;;  %v2819_v57 = vld [vmem:[#allocation2 + $0x18] sm:$0xff]  ;;  %v2822_v59 = vld [vmem:[#allocation2 + $0x20] sm:$0xff]  ;;  %v2825_v61 = vld [vmem:[#allocation2 + $0x28] sm:$0xff] }
 0x1c8   : > { %v2828_v63 = vld [vmem:[#allocation2 + $0x30] sm:$0xff]  ;;  %v2831_v1 = vld [vmem:[#allocation2 + $0x38] sm:$0xff]  ;;  %v2834_v3 = vld [vmem:[#allocation2 + $0x40] sm:$0xff] }
 0x1c9   : > { %v1039_v58 = vadd.f32 %v1038_v56, %v2815_v55  ;;  %v2837_v5 = vld [vmem:[#allocation2 + $0x48] sm:$0xff]  ;;  %v2840_v7 = vld [vmem:[#allocation2 + $0x50] sm:$0xff]  ;;  %v2843_v9 = vld [vmem:[#allocation2 + $0x58] sm:$0xff] }
 0x1ca   : > { %v2846_v11 = vld [vmem:[#allocation2 + $0x60] sm:$0xff]  ;;  %v2849_v13 = vld [vmem:[#allocation2 + $0x68] sm:$0xff]  ;;  %v2852_v15 = vld [vmem:[#allocation2 + $0x70] sm:$0xff] }
 0x1cb   : > { %v1040_v60 = vadd.f32 %v1039_v58, %v2819_v57  ;;  %v2855_v17 = vld [vmem:[#allocation2 + $0x78] sm:$0xff]  ;;  %v2858_v19 = vld [vmem:[#allocation2 + $0x80] sm:$0xff]  ;;  %v2861_v21 = vld [vmem:[#allocation2 + $0x88] sm:$0xff] }
 0x1cc   : > { %v2864_v23 = vld [vmem:[#allocation2 + $0x90] sm:$0xff]  ;;  %v2867_v25 = vld [vmem:[#allocation2 + $0x98] sm:$0xff]  ;;  %v2870_v27 = vld [vmem:[#allocation2 + $0xa0] sm:$0xff] }
 0x1cd   : > { %v1041_v62 = vadd.f32 %v1040_v60, %v2822_v59  ;;  %v2873_v29 = vld [vmem:[#allocation2 + $0xa8] sm:$0xff]  ;;  %v2876_v31 = vld [vmem:[#allocation2 + $0xb0] sm:$0xff]  ;;  %v2879_v33 = vld [vmem:[#allocation2 + $0xb8] sm:$0xff] }
 0x1ce   : > { %v2882_v35 = vld [vmem:[#allocation2 + $0xc0] sm:$0xff]  ;;  %v2885_v37 = vld [vmem:[#allocation2 + $0xc8] sm:$0xff]  ;;  %v2888_v39 = vld [vmem:[#allocation2 + $0xd0] sm:$0xff] }
 0x1cf   : > { %v1042_v0 = vadd.f32 %v1041_v62, %v2825_v61  ;;  %v2891_v41 = vld [vmem:[#allocation2 + $0xd8] sm:$0xff]  ;;  %v2894_v43 = vld [vmem:[#allocation2 + $0xe0] sm:$0xff]  ;;  %v2897_v45 = vld [vmem:[#allocation2 + $0xe8] sm:$0xff] }
 0x1d0   : > { %v2900_v47 = vld [vmem:[#allocation2 + $0xf0] sm:$0xff]  ;;  %v2903_v49 = vld [vmem:[#allocation2 + $0xf8] sm:$0xff]  ;;  %v2906_v51 = vld [vmem:[#allocation2 + $0x100] sm:$0xff] }
 0x1d1   : > { %v1043_v2 = vadd.f32 %v1042_v0, %v2828_v63  ;;  %v880_v56 = vld [vmem:[#allocation2 + $0x108] sm:$0xff]  ;;  %v881_v60 = vld [vmem:[#allocation2 + $0x110] sm:$0xff]  ;;  %v882_v0 = vld [vmem:[#allocation2 + $0x118] sm:$0xff] }
 0x1d3   : > { %v1044_v4 = vadd.f32 %v1043_v2, %v2831_v1 }
 0x1d5   : > { %v1045_v6 = vadd.f32 %v1044_v4, %v2834_v3  ;;  %v883_v4 = vld [vmem:[#allocation2 + $0x120] sm:$0xff] }
 0x1d7   : > { %v1046_v8 = vadd.f32 %v1045_v6, %v2837_v5 }
 0x1d9   : > { %v1047_v10 = vadd.f32 %v1046_v8, %v2840_v7  ;;  %v2910_v8 = vld [vmem:[#allocation2 + $0x128] sm:$0xff] }
 0x1db   : > { %v1048_v12 = vadd.f32 %v1047_v10, %v2843_v9 }
 0x1dd   : > { %v1049_v14 = vadd.f32 %v1048_v12, %v2846_v11 }
 0x1df   : > { %v1050_v16 = vadd.f32 %v1049_v14, %v2849_v13 }
 0x1e1   : > { %v1051_v18 = vadd.f32 %v1050_v16, %v2852_v15 }
 0x1e3   : > { %v1052_v20 = vadd.f32 %v1051_v18, %v2855_v17 }
 0x1e5   : > { %v1053_v22 = vadd.f32 %v1052_v20, %v2858_v19 }
 0x1e7   : > { %v1054_v24 = vadd.f32 %v1053_v22, %v2861_v21 }
 0x1e9   : > { %v1055_v26 = vadd.f32 %v1054_v24, %v2864_v23 }
 0x1eb   : > { %v1056_v28 = vadd.f32 %v1055_v26, %v2867_v25 }
 0x1ed   : > { %v1057_v30 = vadd.f32 %v1056_v28, %v2870_v27 }
 0x1ef   : > { %v1058_v32 = vadd.f32 %v1057_v30, %v2873_v29 }
 0x1f1   : > { %v1059_v34 = vadd.f32 %v1058_v32, %v2876_v31 }
 0x1f3   : > { %v1060_v36 = vadd.f32 %v1059_v34, %v2879_v33 }
 0x1f5   : > { %v1061_v38 = vadd.f32 %v1060_v36, %v2882_v35 }
 0x1f7   : > { %v1062_v40 = vadd.f32 %v1061_v38, %v2885_v37 }
 0x1f9   : > { %v1063_v42 = vadd.f32 %v1062_v40, %v2888_v39 }
 0x1fb   : > { %v1064_v44 = vadd.f32 %v1063_v42, %v2891_v41 }
 0x1fd   : > { %v1065_v46 = vadd.f32 %v1064_v44, %v2894_v43 }
 0x1ff   : > { %v1066_v48 = vadd.f32 %v1065_v46, %v2897_v45 }
 0x201   : > { %v1067_v50 = vadd.f32 %v1066_v48, %v2900_v47 }
 0x203   : > { %v1068_v52 = vadd.f32 %v1067_v50, %v2903_v49 }
 0x205   : > { %v1069_v58 = vadd.f32 %v1068_v52, %v2906_v51 }
 0x207   : > { %v1070_v62 = vadd.f32 %v1069_v58, %v880_v56 }
 0x209   : > { %v1071_v2 = vadd.f32 %v1070_v62, %v881_v60 }
 0x20b   : > { %v1072_v6 = vadd.f32 %v1071_v2, %v882_v0 }
 0x20d   : > { %v1073_v10 = vadd.f32 %v1072_v6, %v883_v4 }
 0x20f   : > { %v1074_v12 = vadd.f32 %v1073_v10, %v2910_v8 }
 0x211   : > { %v1075_v14 = vrot.slane %v1074_v12, 4 }
 0x213   : > { %v1076_v16 = vadd.f32 %v1075_v14, %v1074_v12 }
 0x215   : > { %v1077_v18 = vrot.slane %v1076_v16, 2 }
 0x217   : > { %v1078_v20 = vadd.f32 %v1077_v18, %v1076_v16 }
 0x219   : > { %v1079_v22 = vrot.slane %v1078_v20, 1 }
 0x21b   : > { %v1080_v24 = vadd.f32 %v1079_v22, %v1078_v20 }
 0x21d   : > { %v2913_v26 = vmul.f32 0.0033333334, %v1080_v24 }
 0x21f   : > { %v2916_v28 = vsub.f32 %v880_v56, %v2913_v26  ;;  %v2919_v30 = vsub.f32 %v881_v60, %v2913_v26  ;;  %v2922_v32 = vsub.f32 %v882_v0, %v2913_v26  ;;  %v2925_v34 = vsub.f32 %v883_v4, %v2913_v26 }
 0x220   : > { %v1119_v36 = vsub.f32 %v2910_v8, %v2913_v26  ;;  %v2931_v38 = vsub.f32 %v2811_v53, %v2913_v26  ;;  %v2935_v40 = vsub.f32 %v2813_v54, %v2913_v26  ;;  %v2939_v42 = vsub.f32 %v2815_v55, %v2913_v26 }
 0x221   : > { %3496 = vst [vmem:[#allocation15_spill] sm:$0xff] %v2916_v28  ;;  %3497 = vst [vmem:[#allocation16_spill] sm:$0xff] %v2919_v30  ;;  %v2943_v44 = vsub.f32 %v2819_v57, %v2913_v26  ;;  %v2951_v53 = vsub.f32 %v2822_v59, %v2913_v26  ;;  %v2957_v55 = vsub.f32 %v2825_v61, %v2913_v26 }
 0x222   : > { %3498 = vst [vmem:[#allocation17_spill] sm:$0xff] %v2922_v32  ;;  %3499 = vst [vmem:[#allocation18_spill] sm:$0xff] %v2925_v34  ;;  %v1158_v46 = vmul.f32 %v2931_v38, %v2931_v38  ;;  %v1159_v48 = vmul.f32 %v2935_v40, %v2935_v40  ;;  %v1160_v54 = vmul.f32 %v2939_v42, %v2939_v42 }
 0x223   : > { %v1161_v57 = vmul.f32 %v2943_v44, %v2943_v44  ;;  %v2963_v52 = vsub.f32 %v2828_v63, %v2913_v26  ;;  %v1162_v56 = vmul.f32 %v2951_v53, %v2951_v53  ;;  %v2969_v58 = vsub.f32 %v2831_v1, %v2913_v26 }
 0x224   : > { %v1196_v50 = vadd.f32 %v1159_v48, %v1158_v46  ;;  %v1163_v61 = vmul.f32 %v2957_v55, %v2957_v55  ;;  %v2975_v62 = vsub.f32 %v2834_v3, %v2913_v26  ;;  %v2981_v2 = vsub.f32 %v2837_v5, %v2913_v26 }
 0x225   : > { %v1164_v63 = vmul.f32 %v2963_v52, %v2963_v52  ;;  %v1165_v1 = vmul.f32 %v2969_v58, %v2969_v58  ;;  %v2987_v6 = vsub.f32 %v2840_v7, %v2913_v26  ;;  %v2993_v12 = vsub.f32 %v2843_v9, %v2913_v26 }
 0x226   : > { %v1197_v59 = vadd.f32 %v1196_v50, %v1160_v54  ;;  %v1166_v3 = vmul.f32 %v2975_v62, %v2975_v62  ;;  %v1167_v5 = vmul.f32 %v2981_v2, %v2981_v2  ;;  %v2999_v16 = vsub.f32 %v2846_v11, %v2913_v26 }
 0x227   : > { %v1168_v7 = vmul.f32 %v2987_v6, %v2987_v6  ;;  %v3005_v20 = vsub.f32 %v2849_v13, %v2913_v26  ;;  %v1169_v9 = vmul.f32 %v2993_v12, %v2993_v12  ;;  %v3011_v24 = vsub.f32 %v2852_v15, %v2913_v26 }
 0x228   : > { %v1198_v60 = vadd.f32 %v1197_v59, %v1161_v57  ;;  %v1170_v11 = vmul.f32 %v2999_v16, %v2999_v16  ;;  %v3017_v48 = vsub.f32 %v2855_v17, %v2913_v26  ;;  %v3023_v57 = vsub.f32 %v2858_v19, %v2913_v26 }
 0x229   : > { %v1171_v13 = vmul.f32 %v3005_v20, %v3005_v20  ;;  %v1172_v15 = vmul.f32 %v3011_v24, %v3011_v24 }
 0x22a   : > { %v1199_v0 = vadd.f32 %v1198_v60, %v1162_v56  ;;  %v3029_v56 = vsub.f32 %v2861_v21, %v2913_v26  ;;  %v1173_v17 = vmul.f32 %v3017_v48, %v3017_v48  ;;  %v1174_v19 = vmul.f32 %v3023_v57, %v3023_v57 }
 0x22c   : > { %v1200_v4 = vadd.f32 %v1199_v0, %v1163_v61  ;;  %v3035_v61 = vsub.f32 %v2864_v23, %v2913_v26  ;;  %v1175_v21 = vmul.f32 %v3029_v56, %v3029_v56 }
 0x22e   : > { %v1201_v10 = vadd.f32 %v1200_v4, %v1164_v63  ;;  %v3041_v63 = vsub.f32 %v2867_v25, %v2913_v26  ;;  %v1176_v23 = vmul.f32 %v3035_v61, %v3035_v61 }
 0x230   : > { %v1202_v14 = vadd.f32 %v1201_v10, %v1165_v1  ;;  %v3047_v1 = vsub.f32 %v2870_v27, %v2913_v26  ;;  %v1177_v25 = vmul.f32 %v3041_v63, %v3041_v63 }
 0x232   : > { %v1203_v18 = vadd.f32 %v1202_v14, %v1166_v3  ;;  %v3053_v3 = vsub.f32 %v2873_v29, %v2913_v26  ;;  %v1178_v27 = vmul.f32 %v3047_v1, %v3047_v1 }
 0x234   : > { %v1204_v22 = vadd.f32 %v1203_v18, %v1167_v5  ;;  %v3059_v5 = vsub.f32 %v2876_v31, %v2913_v26  ;;  %v1179_v29 = vmul.f32 %v3053_v3, %v3053_v3 }
 0x236   : > { %v1205_v46 = vadd.f32 %v1204_v22, %v1168_v7  ;;  %v3065_v7 = vsub.f32 %v2879_v33, %v2913_v26  ;;  %v1180_v31 = vmul.f32 %v3059_v5, %v3059_v5 }
 0x238   : > { %v1206_v54 = vadd.f32 %v1205_v46, %v1169_v9  ;;  %v3071_v9 = vsub.f32 %v2882_v35, %v2913_v26  ;;  %v1181_v33 = vmul.f32 %v3065_v7, %v3065_v7 }
 0x23a   : > { %v1207_v50 = vadd.f32 %v1206_v54, %v1170_v11  ;;  %v3077_v11 = vsub.f32 %v2885_v37, %v2913_v26  ;;  %v1182_v35 = vmul.f32 %v3071_v9, %v3071_v9 }
 0x23c   : > { %v1208_v59 = vadd.f32 %v1207_v50, %v1171_v13  ;;  %v3083_v13 = vsub.f32 %v2888_v39, %v2913_v26  ;;  %v1183_v37 = vmul.f32 %v3077_v11, %v3077_v11 }
 0x23e   : > { %v1209_v60 = vadd.f32 %v1208_v59, %v1172_v15  ;;  %v3089_v15 = vsub.f32 %v2891_v41, %v2913_v26  ;;  %v3095_v59 = vsub.f32 %v2894_v43, %v2913_v26  ;;  %v1184_v39 = vmul.f32 %v3083_v13, %v3083_v13 }
 0x240   : > { %v1210_v0 = vadd.f32 %v1209_v60, %v1173_v17  ;;  %v885_v17 = vlaneseq  ;;  %v3101_v60 = vsub.f32 %v2897_v45, %v2913_v26  ;;  %v1185_v41 = vmul.f32 %v3089_v15, %v3089_v15 }
 0x241   : > { %v1186_v43 = vmul.f32 %v3095_v59, %v3095_v59 }
 0x242   : > { %v1211_v4 = vadd.f32 %v1210_v0, %v1174_v19  ;;  %v3105_v0 = vshrl.u32 %v885_v17, 7  ;;  %v1187_v45 = vmul.f32 %v3101_v60, %v3101_v60  ;;  %v1193_v17 = vmul.f32 %v2922_v32, %v2922_v32  ;;  %v3210_v32 = vld [vmem:[#allocation8 + $0x88] sm:$0xff]  }
 0x243   : > { %3505 = vst [vmem:[#allocation24_spill] sm:$0xff] %v3210_v32 }
 0x244   : > { %v1212_v10 = vadd.f32 %v1211_v4, %v1175_v21 }
 0x246   : > { %v1213_v14 = vadd.f32 %v1212_v10, %v1176_v23  ;;  %v3109_v23 = vsub.f32 %v2900_v47, %v2913_v26 }
 0x248   : > { %v1214_v18 = vadd.f32 %v1213_v14, %v1177_v25  ;;  %v3115_v25 = vsub.f32 %v2903_v49, %v2913_v26  ;;  %v3122_v14 = vsub.f32 %v2906_v51, %v2913_v26  ;;  %v1188_v47 = vmul.f32 %v3109_v23, %v3109_v23 }
 0x24a   : > { %v1215_v22 = vadd.f32 %v1214_v18, %v1178_v27  ;;  %v923_v27 = vadd.s32 296, %v3105_v0  ;;  %3500 = vst [vmem:[#allocation19_spill] sm:$0xff] %v3122_v14  ;;  %v1189_v18 = vmul.f32 %v3115_v25, %v3115_v25  ;;  %v1190_v49 = vmul.f32 %v3122_v14, %v3122_v14 }
 0x24c   : > { %v1216_v46 = vadd.f32 %v1215_v22, %v1179_v29  ;;  %vm961_vm1 = vcmp.lt.s32.totalorder %v923_v27, 300 }
 0x24e   : > { %v1217_v54 = vadd.f32 %v1216_v46, %v1180_v31 }
 0x250   : > { %v1218_v50 = vadd.f32 %v1217_v54, %v1181_v33  ;;  %v1191_v33 = vmul.f32 %v2916_v28, %v2916_v28  ;;  %v1192_v54 = vmul.f32 %v2919_v30, %v2919_v30  ;;  %v3212_v30 = vld [vmem:[#allocation8 + $0x90] sm:$0xff]  }
 0x251   : > { %3506 = vst [vmem:[#allocation25_spill] sm:$0xff] %v3212_v30 }
 0x252   : > { %v1219_v19 = vadd.f32 %v1218_v50, %v1182_v35  ;;  %v2502_v35 = vmov 0.0  }
 0x253   : > { %v1804_v51 = vsel %vm961_vm1, 1.0, %v2502_v35  ;;  %v3154_v35 = vld [vmem:[#allocation8 + $0x20] sm:$0xff]  }
 0x254   : > { %v1220_v21 = vadd.f32 %v1219_v19, %v1183_v37  ;;  %v3137_v50 = vmul.f32 %v1804_v51, %v1119_v36  ;;  %v1194_v19 = vmul.f32 %v2925_v34, %v2925_v34  ;;  %v3156_v51 = vld [vmem:[#allocation8 + $0x28] sm:$0xff]  }
 0x256   : > { %v1221_v4 = vadd.f32 %v1220_v21, %v1184_v39  ;;  %3501 = vst [vmem:[#allocation20_spill] sm:$0xff] %v3137_v50  ;;  %v1195_v21 = vmul.f32 %v3137_v50, %v3137_v50 }
 0x258   : > { %v1222_v10 = vadd.f32 %v1221_v4, %v1185_v41 }
 0x25a   : > { %v1223_v29 = vadd.f32 %v1222_v10, %v1186_v43 }
 0x25c   : > { %v1224_v31 = vadd.f32 %v1223_v29, %v1187_v45 }
 0x25e   : > { %v1225_v22 = vadd.f32 %v1224_v31, %v1188_v47  ;;  %v3145_v31 = vld [vmem:[#allocation8] sm:$0xff]  }
 0x260   : > { %v1226_v46 = vadd.f32 %v1225_v22, %v1189_v18  ;;  %v3149_v22 = vld [vmem:[#allocation8 + $0x10] sm:$0xff]  }
 0x262   : > { %v1227_v37 = vadd.f32 %v1226_v46, %v1190_v49  ;;  %v3147_v49 = vld [vmem:[#allocation8 + $0x8] sm:$0xff]   ;;  %v1246_v46 = vsub.s32 0, %v3105_v0  ;;  %v3189_v0 = vld [vmem:[#allocation8 + $0x60] sm:$0xff]  }
 0x264   : > { %v1228_v39 = vadd.f32 %v1227_v37, %v1191_v33  ;;  %v3151_v33 = vld [vmem:[#allocation8 + $0x18] sm:$0xff]   ;;  %v3197_v37 = vld [vmem:[#allocation8 + $0x70] sm:$0xff]  }
 0x265   : > { %3502 = vst [vmem:[#allocation21_spill] sm:$0xff] %v3197_v37 }
 0x266   : > { %v1229_v41 = vadd.f32 %v1228_v39, %v1192_v54 }
 0x268   : > { %v1230_v43 = vadd.f32 %v1229_v41, %v1193_v17  ;;  %v3164_v41 = vld [vmem:[#allocation8 + $0x38] sm:$0xff]   ;;  %v3226_v17 = vld [vmem:[%s3461_s3] ss:$0 sm:$0xff] }
 0x26a   : > { %v1231_v4 = vadd.f32 %v1230_v43, %v1194_v19  ;;  %v3162_v19 = vld [vmem:[#allocation8 + $0x30] sm:$0xff]  }
 0x26c   : > { %v1232_v45 = vadd.f32 %v1231_v4, %v1195_v21  ;;  %v3199_v4 = vld [vmem:[#allocation8 + $0x78] sm:$0xff]  }
 0x26d   : > { %3503 = vst [vmem:[#allocation22_spill] sm:$0xff] %v3199_v4 }
 0x26e   : > { %v1233_v10 = vrot.slane %v1232_v45, 4 }
 0x270   : > { %v1234_v27 = vadd.f32 %v1233_v10, %v1232_v45  ;;  %v3170_v45 = vld [vmem:[#allocation8 + $0x40] sm:$0xff]   ;;  %v3172_v10 = vld [vmem:[#allocation8 + $0x48] sm:$0xff]  }
 0x272   : > { %v1235_v47 = vrot.slane %v1234_v27, 2 }
 0x274   : > { %v1236_v8 = vadd.f32 %v1235_v47, %v1234_v27 }
 0x276   : > { %v1237_v26 = vrot.slane %v1236_v8, 1 }
 0x278   : > { %v1238_v36 = vadd.f32 %v1237_v26, %v1236_v8  ;;  %v3191_v8 = vld [vmem:[#allocation8 + $0x68] sm:$0xff]   ;;  %v3205_v26 = vld [vmem:[#allocation8 + $0x80] sm:$0xff]  }
 0x279   : > { %3504 = vst [vmem:[#allocation23_spill] sm:$0xff] %v3205_v26 }
 0x27a   : > { %v1239_v29 = vmul.f32 0.0033333334, %v1238_v36  ;;  %v3178_v36 = vld [vmem:[#allocation8 + $0x50] sm:$0xff]  }
 0x27c   : > { %v1240_v18 = vadd.f32 1e-05, %v1239_v29  ;;  %v3180_v29 = vld [vmem:[#allocation8 + $0x58] sm:$0xff]  }
 0x27e   : > { %2329 = vrsqrt.f32 %v1240_v18  ;;  %v1242_v18 = vld [vmem:[%s3460_s2] sm:$0x1] }
 0x288   : > { %v2330_v43 = vpop.eup %2329 }
 0x289   : > { %v1243_v21 = vmul.f32 %v2330_v43, %v1242_v18 }
 0x28b   : > { %v3218_v28 = vrot.slane %v1243_v21, %v1246_v46 }
 0x28d   : > { %v1248_v21 = vmul.f32 %v3218_v28, %v2931_v38  ;;  %v1249_v18 = vmul.f32 %v3218_v28, %v2935_v40  ;;  %v1250_v34 = vmul.f32 %v3218_v28, %v2939_v42  ;;  %v1251_v43 = vmul.f32 %v3218_v28, %v2943_v44 }
 0x28e   : > { %v1252_v27 = vmul.f32 %v3218_v28, %v2951_v53  ;;  %v1253_v54 = vmul.f32 %v3218_v28, %v2957_v55  ;;  %v1254_v46 = vmul.f32 %v3218_v28, %v2963_v52  ;;  %v1255_v38 = vmul.f32 %v3218_v28, %v2969_v58 }
 0x28f   : > { %v1293_v40 = vadd.f32 %v3226_v17, %v1248_v21  ;;  %v1294_v47 = vadd.f32 %v3226_v17, %v1249_v18  ;;  %v1295_v42 = vadd.f32 %v3226_v17, %v1250_v34  ;;  %v1296_v44 = vadd.f32 %v3226_v17, %v1251_v43 }
 0x290   : > { %v1297_v50 = vadd.f32 %v3226_v17, %v1252_v27  ;;  %v1298_v53 = vadd.f32 %v3226_v17, %v1253_v54  ;;  %v1299_v55 = vadd.f32 %v3226_v17, %v1254_v46  ;;  %v1300_v39 = vadd.f32 %v3226_v17, %v1255_v38 }
 0x291   : > { %v3507_v52 = vunpack.c.l.bf16 %v3145_v31  ;;  %v3508_v58 = vunpack.c.h.bf16 %v3145_v31  ;;  %v3509_v18 = vunpack.c.l.bf16 %v3147_v49  ;;  %v3510_v34 = vunpack.c.h.bf16 %v3147_v49 }
 0x292   : > { %v3511_v27 = vunpack.c.l.bf16 %v3149_v22  ;;  %v3512_v54 = vunpack.c.h.bf16 %v3149_v22  ;;  %v3513_v38 = vunpack.c.l.bf16 %v3151_v33  ;;  %v1257_v22 = vmul.f32 %v3218_v28, %v2981_v2 }
 0x293   : > { %v1407_v30 = vadd.f32 %v3507_v52, %v1293_v40  ;;  %v1408_v21 = vadd.f32 %v3508_v58, %v1294_v47  ;;  %v1409_v32 = vadd.f32 %v3509_v18, %v1295_v42  ;;  %v1410_v43 = vadd.f32 %v3510_v34, %v1296_v44 }
 0x294   : > { %v1411_v26 = vadd.f32 %v3511_v27, %v1297_v50  ;;  %v1412_v46 = vadd.f32 %v3512_v54, %v1298_v53  ;;  %v1413_v4 = vadd.f32 %v3513_v38, %v1299_v55  ;;  %v3514_v40 = vunpack.c.h.bf16 %v3151_v33 }
 0x295   : > { %v1445_v31 = vmax.f32 %v1407_v30, 0.0  ;;  %v1446_v47 = vmax.f32 %v1408_v21, 0.0  ;;  %v1447_v58 = vmax.f32 %v1409_v32, 0.0  ;;  %v1448_v14 = vmax.f32 %v1410_v43, 0.0 }
 0x296   : > { %v1414_v52 = vadd.f32 %v3514_v40, %v1300_v39  ;;  %v1449_v42 = vmax.f32 %v1411_v26, 0.0  ;;  %v1450_v18 = vmax.f32 %v1412_v46, 0.0  ;;  %v1451_v49 = vmax.f32 %v1413_v4, 0.0 }
 0x297   : > { %v1966_v34 = vpack.c.bf16 %v1446_v47, %v1445_v31  ;;  %v1971_v37 = vpack.c.bf16 %v1448_v14, %v1447_v58  ;;  %v1256_v50 = vmul.f32 %v3218_v28, %v2975_v62  ;;  %v1258_v30 = vmul.f32 %v3218_v28, %v2987_v6 }
 0x298   : > { %v1452_v44 = vmax.f32 %v1414_v52, 0.0  ;;  %v1976_v53 = vpack.c.bf16 %v1450_v18, %v1449_v42  ;;  %v1259_v32 = vmul.f32 %v3218_v28, %v2993_v12  ;;  %v1302_v14 = vadd.f32 %v3226_v17, %v1257_v22 }
 0x299   : > { %1967 = vst [vmem:[#allocation9] sm:$0xff] %v1966_v34   ;;  %2076 = vst [vmem:[#allocation9 + $0x8] sm:$0xff] %v1971_v37   ;;  %v1301_v33 = vadd.f32 %v3226_v17, %v1256_v50  ;;  %v1260_v62 = vmul.f32 %v3218_v28, %v2999_v16  ;;  %v1261_v2 = vmul.f32 %v3218_v28, %v3005_v20  ;;  %v3515_v4 = vunpack.c.l.bf16 %v3154_v35 }
 0x29a   : > { %v1981_v55 = vpack.c.bf16 %v1452_v44, %v1451_v49  ;;  %2077 = vst [vmem:[#allocation9 + $0x10] sm:$0xff] %v1976_v53   ;;  %v1303_v39 = vadd.f32 %v3226_v17, %v1258_v30  ;;  %v1304_v6 = vadd.f32 %v3226_v17, %v1259_v32  ;;  %v1262_v12 = vmul.f32 %v3218_v28, %v3011_v24 }
 0x29b   : > { %v1263_v37 = vmul.f32 %v3218_v28, %v3017_v48  ;;  %v1415_v26 = vadd.f32 %v3515_v4, %v1301_v33  ;;  %v3516_v16 = vunpack.c.h.bf16 %v3154_v35  ;;  %v1305_v20 = vadd.f32 %v3226_v17, %v1260_v62 }
 0x29c   : > { %2078 = vst [vmem:[#allocation9 + $0x18] sm:$0xff] %v1981_v55   ;;  %v1306_v43 = vadd.f32 %v3226_v17, %v1261_v2  ;;  %v3517_v27 = vunpack.c.l.bf16 %v3156_v51  ;;  %v3518_v46 = vunpack.c.h.bf16 %v3156_v51  ;;  %v1307_v24 = vadd.f32 %v3226_v17, %v1262_v12 }
 0x29d   : > { %v1416_v21 = vadd.f32 %v3516_v16, %v1302_v14  ;;  %v1308_v48 = vadd.f32 %v3226_v17, %v1263_v37  ;;  %v1453_v40 = vmax.f32 %v1415_v26, 0.0  ;;  %v3519_v31 = vunpack.c.l.bf16 %v3162_v19 }
 0x29e   : > { %v1417_v54 = vadd.f32 %v3517_v27, %v1303_v39  ;;  %v1418_v38 = vadd.f32 %v3518_v46, %v1304_v6  ;;  %v3520_v47 = vunpack.c.h.bf16 %v3162_v19  ;;  %v3521_v49 = vunpack.c.l.bf16 %v3164_v41 }
 0x29f   : > { %v1454_v52 = vmax.f32 %v1416_v21, 0.0  ;;  %v1419_v35 = vadd.f32 %v3519_v31, %v1305_v20  ;;  %v3522_v51 = vunpack.c.h.bf16 %v3164_v41  ;;  %v1264_v55 = vmul.f32 %v3218_v28, %v3023_v57 }
 0x2a0   : > { %v1420_v58 = vadd.f32 %v3520_v47, %v1306_v43  ;;  %v1455_v42 = vmax.f32 %v1417_v54, 0.0  ;;  %v1456_v18 = vmax.f32 %v1418_v38, 0.0  ;;  %v1421_v44 = vadd.f32 %v3521_v49, %v1307_v24 }
 0x2a1   : > { %v1422_v34 = vadd.f32 %v3522_v51, %v1308_v48  ;;  %v1986_v50 = vpack.c.bf16 %v1454_v52, %v1453_v40  ;;  %v1457_v22 = vmax.f32 %v1419_v35, 0.0  ;;  %v1265_v19 = vmul.f32 %v3218_v28, %v3029_v56 }
 0x2a2   : > { %v1458_v53 = vmax.f32 %v1420_v58, 0.0  ;;  %v1991_v30 = vpack.c.bf16 %v1456_v18, %v1455_v42  ;;  %v1459_v32 = vmax.f32 %v1421_v44, 0.0  ;;  %v1309_v62 = vadd.f32 %v3226_v17, %v1264_v55 }
 0x2a3   : > { %v1460_v33 = vmax.f32 %v1422_v34, 0.0  ;;  %2079 = vst [vmem:[#allocation9 + $0x20] sm:$0xff] %v1986_v50   ;;  %v1266_v41 = vmul.f32 %v3218_v28, %v3035_v61  ;;  %v1267_v2 = vmul.f32 %v3218_v28, %v3041_v63  ;;  %v1310_v57 = vadd.f32 %v3226_v17, %v1265_v19 }
 0x2a4   : > { %v1996_v14 = vpack.c.bf16 %v1458_v53, %v1457_v22  ;;  %2080 = vst [vmem:[#allocation9 + $0x28] sm:$0xff] %v1991_v30   ;;  %v1268_v6 = vmul.f32 %v3218_v28, %v3047_v1  ;;  %v1269_v56 = vmul.f32 %v3218_v28, %v3053_v3  ;;  %v3523_v12 = vunpack.c.l.bf16 %v3170_v45 }
 0x2a5   : > { %v2001_v39 = vpack.c.bf16 %v1460_v33, %v1459_v32  ;;  %v1311_v4 = vadd.f32 %v3226_v17, %v1266_v41  ;;  %v1312_v61 = vadd.f32 %v3226_v17, %v1267_v2  ;;  %v1270_v63 = vmul.f32 %v3218_v28, %v3059_v5 }
 0x2a6   : > { %2081 = vst [vmem:[#allocation9 + $0x30] sm:$0xff] %v1996_v14   ;;  %v1423_v37 = vadd.f32 %v3523_v12, %v1309_v62  ;;  %v3524_v26 = vunpack.c.h.bf16 %v3170_v45  ;;  %v1313_v1 = vadd.f32 %v3226_v17, %v1268_v6  ;;  %v1314_v21 = vadd.f32 %v3226_v17, %v1269_v56 }
 0x2a7   : > { %2082 = vst [vmem:[#allocation9 + $0x38] sm:$0xff] %v2001_v39   ;;  %v1271_v3 = vmul.f32 %v3218_v28, %v3065_v7  ;;  %v3525_v43 = vunpack.c.l.bf16 %v3172_v10  ;;  %v3526_v54 = vunpack.c.h.bf16 %v3172_v10  ;;  %v1315_v5 = vadd.f32 %v3226_v17, %v1270_v63 }
 0x2a8   : > { %v1424_v16 = vadd.f32 %v3524_v26, %v1310_v57  ;;  %v1461_v20 = vmax.f32 %v1423_v37, 0.0  ;;  %v3527_v45 = vunpack.c.l.bf16 %v3178_v36  ;;  %v3528_v48 = vunpack.c.h.bf16 %v3178_v36 }
 0x2a9   : > { %v1425_v27 = vadd.f32 %v3525_v43, %v1311_v4  ;;  %v1426_v46 = vadd.f32 %v3526_v54, %v1312_v61  ;;  %v1316_v52 = vadd.f32 %v3226_v17, %v1271_v3  ;;  %v3529_v35 = vunpack.c.l.bf16 %v3180_v29 }
 0x2aa   : > { %v1462_v38 = vmax.f32 %v1424_v16, 0.0  ;;  %v1427_v24 = vadd.f32 %v3527_v45, %v1313_v1  ;;  %v1428_v40 = vadd.f32 %v3528_v48, %v1314_v21  ;;  %v1272_v10 = vmul.f32 %v3218_v28, %v3071_v9  ;;  %v3538_v16 = vld [vmem:[#allocation19_spill] sm:$0xff] }
 0x2ab   : > { %v1463_v31 = vmax.f32 %v1425_v27, 0.0  ;;  %v1464_v7 = vmax.f32 %v1426_v46, 0.0  ;;  %v1429_v47 = vadd.f32 %v3529_v35, %v1315_v5  ;;  %v3530_v49 = vunpack.c.h.bf16 %v3180_v29  ;;  %v3541_v5 = vld [vmem:[#allocation15_spill] sm:$0xff]  ;;  %v3543_v35 = vld [vmem:[#allocation16_spill] sm:$0xff] }
 0x2ac   : > { %v2006_v58 = vpack.c.bf16 %v1462_v38, %v1461_v20  ;;  %v1465_v42 = vmax.f32 %v1427_v24, 0.0  ;;  %v1466_v18 = vmax.f32 %v1428_v40, 0.0  ;;  %v1273_v36 = vmul.f32 %v3218_v28, %v3077_v11  ;;  %v3539_v20 = vld [vmem:[#allocation22_spill] sm:$0xff] }
 0x2ad   : > { %v1430_v44 = vadd.f32 %v3530_v49, %v1316_v52  ;;  %v2011_v51 = vpack.c.bf16 %v1464_v7, %v1463_v31  ;;  %v1467_v34 = vmax.f32 %v1429_v47, 0.0  ;;  %v1317_v50 = vadd.f32 %v3226_v17, %v1272_v10  ;;  %v3544_v10 = vld [vmem:[#allocation17_spill] sm:$0xff] }
 0x2ae   : > { %2083 = vst [vmem:[#allocation9 + $0x40] sm:$0xff] %v2006_v58   ;;  %v2016_v22 = vpack.c.bf16 %v1466_v18, %v1465_v42  ;;  %v1274_v55 = vmul.f32 %v3218_v28, %v3083_v13  ;;  %v1275_v9 = vmul.f32 %v3218_v28, %v3089_v15  ;;  %v1318_v29 = vadd.f32 %v3226_v17, %v1273_v36  ;;  %v3545_v18 = vld [vmem:[#allocation23_spill] sm:$0xff]  ;;  %v3548_v36 = vld [vmem:[#allocation20_spill] sm:$0xff] }
 0x2af   : > { %v1468_v53 = vmax.f32 %v1430_v44, 0.0  ;;  %2084 = vst [vmem:[#allocation9 + $0x48] sm:$0xff] %v2011_v51   ;;  %v3531_v30 = vunpack.c.l.bf16 %v3189_v0  ;;  %v1276_v11 = vmul.f32 %v3218_v28, %v3095_v59  ;;  %v1277_v33 = vmul.f32 %v3218_v28, %v3101_v60  ;;  %v3547_v51 = vld [vmem:[#allocation18_spill] sm:$0xff] }
 0x2b0   : > { %2085 = vst [vmem:[#allocation9 + $0x50] sm:$0xff] %v2016_v22   ;;  %v1319_v14 = vadd.f32 %v3226_v17, %v1274_v55  ;;  %v1320_v13 = vadd.f32 %v3226_v17, %v1275_v9  ;;  %v1278_v15 = vmul.f32 %v3218_v28, %v3109_v23  ;;  %v3532_v62 = vunpack.c.h.bf16 %v3189_v0  ;;  %v3535_v0 = vld [vmem:[#allocation21_spill] sm:$0xff] }
 0x2b1   : > { %v1431_v32 = vadd.f32 %v3531_v30, %v1317_v50  ;;  %v2021_v19 = vpack.c.bf16 %v1468_v53, %v1467_v34  ;;  %v1321_v39 = vadd.f32 %v3226_v17, %v1276_v11  ;;  %v1322_v59 = vadd.f32 %v3226_v17, %v1277_v33 }
 0x2b2   : > { %v1432_v41 = vadd.f32 %v3532_v62, %v1318_v29  ;;  %v3533_v60 = vunpack.c.l.bf16 %v3191_v8  ;;  %v3534_v6 = vunpack.c.h.bf16 %v3191_v8  ;;  %v1279_v12 = vmul.f32 %v3218_v28, %v3115_v25  ;;  %v3553_v62 = vld [vmem:[#allocation25_spill] sm:$0xff] }
 0x2b3   : > { %v1469_v2 = vmax.f32 %v1431_v32, 0.0  ;;  %2086 = vst [vmem:[#allocation9 + $0x58] sm:$0xff] %v2021_v19   ;;  %v1323_v23 = vadd.f32 %v3226_v17, %v1278_v15  ;;  %v3536_v4 = vunpack.c.l.bf16 %v3535_v0  ;;  %v3537_v63 = vunpack.c.h.bf16 %v3535_v0  ;;  %v3550_v19 = vld [vmem:[#allocation24_spill] sm:$0xff] }
 0x2b4   : > { %v1433_v57 = vadd.f32 %v3533_v60, %v1319_v14  ;;  %v1434_v56 = vadd.f32 %v3534_v6, %v1320_v13  ;;  %v1470_v37 = vmax.f32 %v1432_v41, 0.0  ;;  %v1280_v1 = vmul.f32 %v3218_v28, %v3538_v16 }
 0x2b5   : > { %v1435_v61 = vadd.f32 %v3536_v4, %v1321_v39  ;;  %v1436_v26 = vadd.f32 %v3537_v63, %v1322_v59  ;;  %v1324_v8 = vadd.f32 %v3226_v17, %v1279_v12  ;;  %v3540_v43 = vunpack.c.l.bf16 %v3539_v20 }
 0x2b6   : > { %v1471_v21 = vmax.f32 %v1433_v57, 0.0  ;;  %v1472_v3 = vmax.f32 %v1434_v56, 0.0  ;;  %v2026_v25 = vpack.c.bf16 %v1470_v37, %v1469_v2  ;;  %v1281_v38 = vmul.f32 %v3218_v28, %v3541_v5 }
 0x2b7   : > { %v1437_v27 = vadd.f32 %v3540_v43, %v1323_v23  ;;  %v1473_v54 = vmax.f32 %v1435_v61, 0.0  ;;  %v1474_v46 = vmax.f32 %v1436_v26, 0.0  ;;  %v3542_v24 = vunpack.c.h.bf16 %v3539_v20 }
 0x2b8   : > { %v2031_v45 = vpack.c.bf16 %v1472_v3, %v1471_v21  ;;  %v1325_v52 = vadd.f32 %v3226_v17, %v1280_v1  ;;  %2087 = vst [vmem:[#allocation9 + $0x60] sm:$0xff] %v2026_v25   ;;  %v1326_v7 = vadd.f32 %v3226_v17, %v1281_v38  ;;  %v1282_v47 = vmul.f32 %v3218_v28, %v3543_v35 }
 0x2b9   : > { %v1438_v48 = vadd.f32 %v3542_v24, %v1324_v8  ;;  %v1475_v40 = vmax.f32 %v1437_v27, 0.0  ;;  %v2036_v31 = vpack.c.bf16 %v1474_v46, %v1473_v54  ;;  %v1283_v58 = vmul.f32 %v3218_v28, %v3544_v10 }
 0x2ba   : > { %2088 = vst [vmem:[#allocation9 + $0x68] sm:$0xff] %v2031_v45   ;;  %v3546_v49 = vunpack.c.l.bf16 %v3545_v18  ;;  %v1284_v34 = vmul.f32 %v3218_v28, %v3547_v51  ;;  %v1285_v50 = vmul.f32 %v3218_v28, %v3548_v36  ;;  %v3549_v22 = vunpack.c.h.bf16 %v3545_v18 }
 0x2bb   : > { %v1476_v42 = vmax.f32 %v1438_v48, 0.0  ;;  %2089 = vst [vmem:[#allocation9 + $0x70] sm:$0xff] %v2036_v31   ;;  %v1327_v55 = vadd.f32 %v3226_v17, %v1282_v47  ;;  %v1328_v9 = vadd.f32 %v3226_v17, %v1283_v58  ;;  %v3551_v14 = vunpack.c.l.bf16 %v3550_v19 }
 0x2bc   : > { %v1439_v44 = vadd.f32 %v3546_v49, %v1325_v52  ;;  %v1440_v53 = vadd.f32 %v3549_v22, %v1326_v7  ;;  %v1329_v32 = vadd.f32 %v3226_v17, %v1284_v34  ;;  %v1330_v11 = vadd.f32 %v3226_v17, %v1285_v50 }
 0x2bd   : > { %v2041_v29 = vpack.c.bf16 %v1476_v42, %v1475_v40  ;;  %v1441_v13 = vadd.f32 %v3551_v14, %v1327_v55  ;;  %v3552_v28 = vunpack.c.h.bf16 %v3550_v19  ;;  %v3554_v41 = vunpack.c.l.bf16 %v3553_v62 }
 0x2be   : > { %v1477_v30 = vmax.f32 %v1439_v44, 0.0  ;;  %v1478_v33 = vmax.f32 %v1440_v53, 0.0  ;;  %v3555_v39 = vunpack.c.h.bf16 %v3553_v62 }
 0x2bf   : > { %v1442_v15 = vadd.f32 %v3552_v28, %v1328_v9  ;;  %2090 = vst [vmem:[#allocation9 + $0x78] sm:$0xff] %v2041_v29   ;;  %v1443_v2 = vadd.f32 %v3554_v41, %v1329_v32  ;;  %v1479_v57 = vmax.f32 %v1441_v13, 0.0 }
 0x2c0   : > { %v1444_v59 = vadd.f32 %v3555_v39, %v1330_v11  ;;  %v2046_v60 = vpack.c.bf16 %v1478_v33, %v1477_v30 }
 0x2c1   : > { %v1480_v6 = vmax.f32 %v1442_v15, 0.0  ;;  %v1481_v56 = vmax.f32 %v1443_v2, 0.0 }
 0x2c2   : > { %v1482_v12 = vmax.f32 %v1444_v59, 0.0  ;;  %2091 = vst [vmem:[#allocation9 + $0x80] sm:$0xff] %v2046_v60  }
 0x2c3   : > { %v2051_v17 = vpack.c.bf16 %v1480_v6, %v1479_v57 }
 0x2c4   : > { %v2056_v23 = vpack.c.bf16 %v1482_v12, %v1481_v56 }
 0x2c5   : > { %2092 = vst [vmem:[#allocation9 + $0x88] sm:$0xff] %v2051_v17  }
 0x2c6   : > { %2093 = vst [vmem:[#allocation9 + $0x90] sm:$0xff] %v2056_v23  }
 0x2c7 PF: > { %p2257_p5 = scmp.eq.s32.totalorder %s2555_s22, 1  ;;  %s2503_s16 = smov [#allocation9]  }
 0x2c8   : > { %s1679_s14 = sshll.u32 %s2503_s16, 4  ;;  %s1680_s14 = int_to_ptr.vmem [resolvable:$true] %s1679_s14 }
 0x2c9   : > { %s2419_s7 = scalar_lea.vmem %s1680_s14, 2432  ;;  %p2426_p12 = scmp.lt.s32.totalorder %s1680_s14, %s1680_s14 }
 0x2ca   : > { %p2420_p10 = scmp.ne.s32.totalorder %s1680_s14, %s2419_s7  ;;  %p2427_p2 = scmp.lt.s32.totalorder %s2419_s7, %s2419_s7 }
 0x2cc   : > { %p2421_p0 = pnand %p2420_p10, %p2257_p5  ;;  %p2428_p6 = por %p2427_p2, %p2426_p12 }
 0x2ce   : > { %p2422_p1 = pneg %p2421_p0 }
 0x2d0   : > { %p2429_p7 = pnand %p2428_p6, %p2422_p1 }
 0x2d2   : > { %2432 = shalt.err (!%p2429_p7)
}
 0x2d3   : > { %s2433_s21 = scalar_lea.hbm %s3463_s5, 2432 }
 0x2d4   : > { %p2434_p9 = scmp.ne.s32.totalorder %s3463_s5, %s2433_s21  ;;  %p2439_p4 = scmp.lt.u32.totalorder %s2433_s21, %s3463_s5 }
 0x2d6   : > { %p2435_p3 = pnand %p2434_p9, %p2257_p5 }
 0x2d8   : > { %p2436_p8 = pneg %p2435_p3 }
 0x2da   : > { %p2441_p11 = pnand %p2439_p4, %p2436_p8 }
 0x2dc   : > { %2444 = shalt.err (!%p2441_p11)
}
 0x2dd   : > { %s2504_s12 = smov 64   ;;  %s2505_s11 = smov 4  }
 0x2de   : > { %2240 = dma.vmem_to_hbm [thread:$0]  (%p2257_p5), %s1680_s14, 2432, %s3463_s5, [#allocation5], %s2504_s12, %s2504_s12, %s2505_s11  }
 0x2df   : > { %2474 = dma.done.wait (%p2257_p5), [#allocation5], 2432  }
 0x2e0   : > { %2476 = vsyncadd (%p2257_p5), [#allocation5], 4294964864 }
 0x2e1 PF: > { %s3556_s8 = sld [smem:[#allocation14_spill]]  ;;  %p19_p13 = scmp.ge.s32.totalorder %s2558_s23, 4  }
 0x2e2   : > { %s3557_s18 = smov %s2483_s19  ;;  %s3558_s19 = smov %s2487_s20 }
 0x2e3   : > { %s3560_s21 = smov %s2558_s23  ;;  %21 = sbr.rel (!%p19_p13) target bundleno = 6 (0x6), region = 102 }
 0x2e7   : > { %s3559_s20 = smov %s3556_s8 }
 0x2ea   :  { %1695 = vsyncpa [#allocation4], 1 }
 0x2eb   :  { %1697 = vsyncpa [#allocation4 + $0x1], 1 }
 0x2ec   :  { %1698 = vsyncpa [#allocation7], 1 }
 0x2ed   :  { %1700 = vsyncpa [#allocation7 + $0x1], 1 }
 0x2ee   :  { %1701 = vsyncpa [#allocation5], 1 }
 0x2ef   :  { %1703 = vsyncpa [#allocation5 + $0x1], 1 }

</bundles_post_ra>
